<compile_context>
chip_gen: v7x
topology: tpu7x:2x2x1
jax: 0.10.0
libtpu: 0.0.40
codegen_flags: <defaults>
</compile_context>

<pallas_src>
import jax
import jax.numpy as jnp
from jax.experimental import pallas as pl
from jax.experimental.pallas import tpu as pltpu


def actor_critic_kernel(x_ref, hx0_ref, cx0_ref,
                        w1_ref, b1_ref,
                        wg_ref, bg_ref,
                        wh_ref, bh_ref,
                        heads_ref, hx_out_ref, cx_out_ref,
                        h_sc, c_sc, xh_sc):
    t = pl.program_id(0)
    H = h_sc.shape[-1]

    # Load the recurrent state into VMEM scratch on the first step only.
    @pl.when(t == 0)
    def _():
        h_sc[...] = hx0_ref[...]
        c_sc[...] = cx0_ref[...]

    # linear1 + ELU (alpha=1.0, F.elu default). exp argument is clamped to <= 0
    # so the masked-out branch never overflows.
    x = x_ref[0]                                              # (B, IN_P) f32
    z = (jnp.dot(x.astype(jnp.bfloat16), w1_ref[...],
                 preferred_element_type=jnp.float32) + b1_ref[...])
    x1 = jnp.where(z > 0, z, jnp.exp(jnp.minimum(z, 0.0)) - 1.0)

    # Fused LSTM gates: [x1 | hx] @ [W_ih ; W_hh] + (b_ih + b_hh), gate order i,f,g,o.
    xh_sc[:, :H] = x1.astype(jnp.bfloat16)
    xh_sc[:, H:] = h_sc[...].astype(jnp.bfloat16)
    gates = (jnp.dot(xh_sc[...], wg_ref[...],
                     preferred_element_type=jnp.float32) + bg_ref[...])

    i_g = jax.nn.sigmoid(gates[:, 0 * H:1 * H])
    f_g = jax.nn.sigmoid(gates[:, 1 * H:2 * H])
    g_g = jnp.tanh(gates[:, 2 * H:3 * H])
    o_g = jax.nn.sigmoid(gates[:, 3 * H:4 * H])
    c_new = f_g * c_sc[...] + i_g * g_g
    h_new = o_g * jnp.tanh(c_new)
    h_sc[...] = h_new
    c_sc[...] = c_new

    # Fused critic|actor head: one lane-dense (B, 128) slab per step.
    heads_ref[0] = (jnp.dot(h_new.astype(jnp.bfloat16), wh_ref[...],
                            preferred_element_type=jnp.float32) + bh_ref[...])

    # Recurrent state is written back to HBM only once (constant-index output).
    @pl.when(t == pl.num_programs(0) - 1)
    def _():
        hx_out_ref[...] = h_new
        cx_out_ref[...] = c_new


def actor_critic_rollout(x_seq, hx, cx, p):
    """Run T fused ActorCritic steps. x_seq: (T, B, num_inputs)."""
    T, B, F = x_seq.shape
    H = p["hidden"]
    IN_P = p["in_pad"]
    HP = p["head_pad"]
    A = p["num_actions"]

    x_pad = x_seq if IN_P == F else jnp.pad(x_seq, ((0, 0), (0, 0), (0, IN_P - F)))

    # Advisory cost estimate for XLA scheduling.
    flops = 2 * T * B * (IN_P * H + (2 * H) * (4 * H) + H * HP)
    transcendentals = 6 * T * B * H
    bytes_accessed = (
        2 * (p["w1"].size + p["w_gates"].size + p["w_heads"].size)            # bf16 weights
        + 4 * (p["b1"].size + p["b_gates"].size + p["b_heads"].size)          # f32 biases
        + 4 * (x_pad.size + T * B * HP + 4 * B * H))                          # acts + state

    grid_spec = pltpu.PrefetchScalarGridSpec(
        num_scalar_prefetch=0,
        grid=(T,),
        in_specs=[
            pl.BlockSpec((1, B, IN_P), lambda t: (t, 0, 0)),   # x_t
            pl.BlockSpec((B, H), lambda t: (0, 0)),            # hx0  (resident)
            pl.BlockSpec((B, H), lambda t: (0, 0)),            # cx0  (resident)
            pl.BlockSpec((IN_P, H), lambda t: (0, 0)),         # w1   (resident)
            pl.BlockSpec((1, H), lambda t: (0, 0)),            # b1
            pl.BlockSpec((2 * H, 4 * H), lambda t: (0, 0)),    # w_gates (resident)
            pl.BlockSpec((1, 4 * H), lambda t: (0, 0)),        # b_gates
            pl.BlockSpec((H, HP), lambda t: (0, 0)),           # w_heads (resident)
            pl.BlockSpec((1, HP), lambda t: (0, 0)),           # b_heads
        ],
        out_specs=[
            pl.BlockSpec((1, B, HP), lambda t: (t, 0, 0)),     # heads slab per step
            pl.BlockSpec((B, H), lambda t: (0, 0)),            # hx_out (written once)
            pl.BlockSpec((B, H), lambda t: (0, 0)),            # cx_out (written once)
        ],
        scratch_shapes=[
            pltpu.VMEM((B, H), jnp.float32),                   # h state carry
            pltpu.VMEM((B, H), jnp.float32),                   # c state carry
            pltpu.VMEM((B, 2 * H), jnp.bfloat16),              # [x1 | hx] for fused gates
        ],
    )

    heads, hx_new, cx_new = pl.pallas_call(
        actor_critic_kernel,
        out_shape=(
            jax.ShapeDtypeStruct((T, B, HP), jnp.float32),
            jax.ShapeDtypeStruct((B, H), jnp.float32),
            jax.ShapeDtypeStruct((B, H), jnp.float32),
        ),
        grid_spec=grid_spec,
        compiler_params=pltpu.CompilerParams(
            dimension_semantics=("arbitrary",)),
        input_output_aliases={1: 1, 2: 2},                     # hx->hx_out, cx->cx_out
        cost_estimate=pl.CostEstimate(flops=flops,
                                      transcendentals=transcendentals,
                                      bytes_accessed=bytes_accessed),
    )(x_pad, hx, cx,
      p["w1"], p["b1"], p["w_gates"], p["b_gates"], p["w_heads"], p["b_heads"])
    # TODO(synk): for B >= 16 on v7x add a leading "parallel" batch grid axis so
    # both TensorCores are used; at B=8 there is nothing to split.

    critic = heads[:, :, 0:1]
    actor = heads[:, :, 1:1 + A]
    return critic, actor, (hx_new, cx_new)


def actor_critic_forward(x, hx, cx, p):
    """Single-step forward with the original module's semantics."""
    critic, actor, state = actor_critic_rollout(x[None], hx, cx, p)
    return critic[0], actor[0], state


def init_params(key, num_inputs, hidden, num_actions):
    """PyTorch-equivalent init: xavier_uniform + zero bias for Linear layers,
    uniform(-1/sqrt(H), 1/sqrt(H)) for the LSTMCell. Stored as (in, out)."""
    ks = jax.random.split(key, 8)

    def xavier(k, fan_in, fan_out):
        limit = (6.0 / (fan_in + fan_out)) ** 0.5
        return jax.random.uniform(k, (fan_in, fan_out), jnp.float32, -limit, limit)

    stdv = 1.0 / (hidden ** 0.5)
    return {
        "w1": xavier(ks[0], num_inputs, hidden),
        "b1": jnp.zeros((1, hidden), jnp.float32),
        "wih": jax.random.uniform(ks[1], (hidden, 4 * hidden), jnp.float32, -stdv, stdv),
        "bih": jax.random.uniform(ks[2], (1, 4 * hidden), jnp.float32, -stdv, stdv),
        "whh": jax.random.uniform(ks[3], (hidden, 4 * hidden), jnp.float32, -stdv, stdv),
        "bhh": jax.random.uniform(ks[4], (1, 4 * hidden), jnp.float32, -stdv, stdv),
        "wc": xavier(ks[5], hidden, 1),
        "bc": jnp.zeros((1, 1), jnp.float32),
        "wa": xavier(ks[6], hidden, num_actions),
        "ba": jnp.zeros((1, num_actions), jnp.float32),
    }


def prepare_kernel_params(p, num_inputs, hidden, num_actions):
    """One-time weight prep: pad/fuse/concat, cast weights to bf16."""
    in_pad = ((num_inputs + 127) // 128) * 128
    head_pad = ((1 + num_actions + 127) // 128) * 128

    w1 = jnp.zeros((in_pad, hidden), jnp.float32).at[:num_inputs, :].set(p["w1"])
    w_gates = jnp.concatenate([p["wih"], p["whh"]], axis=0)        # (2H, 4H)
    b_gates = p["bih"] + p["bhh"]                                   # (1, 4H)
    w_heads = (jnp.zeros((hidden, head_pad), jnp.float32)
               .at[:, 0:1].set(p["wc"])
               .at[:, 1:1 + num_actions].set(p["wa"]))
    b_heads = (jnp.zeros((1, head_pad), jnp.float32)
               .at[:, 0:1].set(p["bc"])
               .at[:, 1:1 + num_actions].set(p["ba"]))

    return {
        "w1": w1.astype(jnp.bfloat16),
        "b1": p["b1"],
        "w_gates": w_gates.astype(jnp.bfloat16),
        "b_gates": b_gates,
        "w_heads": w_heads.astype(jnp.bfloat16),
        "b_heads": b_heads,
        "num_inputs": num_inputs,
        "num_actions": num_actions,
        "hidden": hidden,
        "in_pad": in_pad,
        "head_pad": head_pad,
    }


def _ref_step(x, h, c, p):
    """Pure-JAX reference of one step, using the same bf16-prepared weights."""
    H = p["hidden"]
    xp = jnp.pad(x, ((0, 0), (0, p["in_pad"] - x.shape[-1])))
    z = (jnp.dot(xp.astype(jnp.bfloat16), p["w1"],
                 preferred_element_type=jnp.float32) + p["b1"])
    x1 = jnp.where(z > 0, z, jnp.exp(jnp.minimum(z, 0.0)) - 1.0)
    xh = jnp.concatenate([x1.astype(jnp.bfloat16), h.astype(jnp.bfloat16)], axis=-1)
    gates = (jnp.dot(xh, p["w_gates"],
                     preferred_element_type=jnp.float32) + p["b_gates"])
    i_g = jax.nn.sigmoid(gates[:, 0 * H:1 * H])
    f_g = jax.nn.sigmoid(gates[:, 1 * H:2 * H])
    g_g = jnp.tanh(gates[:, 2 * H:3 * H])
    o_g = jax.nn.sigmoid(gates[:, 3 * H:4 * H])
    c_new = f_g * c + i_g * g_g
    h_new = o_g * jnp.tanh(c_new)
    heads = (jnp.dot(h_new.astype(jnp.bfloat16), p["w_heads"],
                     preferred_element_type=jnp.float32) + p["b_heads"])
    return heads[:, 0:1], heads[:, 1:1 + p["num_actions"]], h_new, c_new


if __name__ == "__main__":
    B = 8            # batch
    NUM_INPUTS = 64  # observation features
    HIDDEN = 256     # fixed by the module (linear1 -> 256, LSTMCell(256, 256))
    NUM_ACTIONS = 8  # action_space.n
    T = 4            # rollout length fused into one kernel launch

    key = jax.random.PRNGKey(0)
    k_x, k_h, k_c, k_p = jax.random.split(key, 4)

    x_seq = jax.random.normal(k_x, (T, B, NUM_INPUTS), jnp.float32)
    hx = jax.random.normal(k_h, (B, HIDDEN), jnp.float32)
    cx = jax.random.normal(k_c, (B, HIDDEN), jnp.float32)

    raw = init_params(k_p, NUM_INPUTS, HIDDEN, NUM_ACTIONS)
    params = prepare_kernel_params(raw, NUM_INPUTS, HIDDEN, NUM_ACTIONS)

    # Fused multi-step rollout.
    critic_seq, actor_seq, (hx_new, cx_new) = actor_critic_rollout(x_seq, hx, cx, params)
    jax.block_until_ready((critic_seq, actor_seq, hx_new, cx_new))

    # Pure-JAX reference rollout (same math, same bf16 weights).
    h_ref, c_ref = hx, cx
    ok = True
    for t in range(T):
        crit_r, act_r, h_ref, c_ref = _ref_step(x_seq[t], h_ref, c_ref, params)
        ok &= bool(jnp.allclose(critic_seq[t], crit_r, atol=1e-2, rtol=1e-2))
        ok &= bool(jnp.allclose(actor_seq[t], act_r, atol=1e-2, rtol=1e-2))
    ok &= bool(jnp.allclose(hx_new, h_ref, atol=1e-2, rtol=1e-2))
    ok &= bool(jnp.allclose(cx_new, c_ref, atol=1e-2, rtol=1e-2))

    # Single-step forward (exact semantics of the original module's forward()).
    crit1, act1, (h1, c1) = actor_critic_forward(x_seq[0], hx, cx, params)
    jax.block_until_ready((crit1, act1, h1, c1))
    crit_r0, act_r0, h_r0, c_r0 = _ref_step(x_seq[0], hx, cx, params)
    ok &= bool(jnp.allclose(crit1, crit_r0, atol=1e-2, rtol=1e-2))
    ok &= bool(jnp.allclose(act1, act_r0, atol=1e-2, rtol=1e-2))
    ok &= bool(jnp.allclose(h1, h_r0, atol=1e-2, rtol=1e-2))
    ok &= bool(jnp.allclose(c1, c_r0, atol=1e-2, rtol=1e-2))

    assert ok, "Pallas kernel does not match pure-JAX reference"
    print("KERNEL_OK")
</pallas_src>

<mosaic_0001>
module attributes {stable_mosaic.version = 11 : i64} {
  func.func @actor_critic_kernel(%arg0: i32, %arg1: memref<1x8x128xf32, #tpu.memory_space<vmem>>, %arg2: memref<8x256xf32, #tpu.memory_space<vmem>>, %arg3: memref<8x256xf32, #tpu.memory_space<vmem>>, %arg4: memref<128x256xbf16, #tpu.memory_space<vmem>>, %arg5: memref<1x256xf32, #tpu.memory_space<vmem>>, %arg6: memref<512x1024xbf16, #tpu.memory_space<vmem>>, %arg7: memref<1x1024xf32, #tpu.memory_space<vmem>>, %arg8: memref<256x128xbf16, #tpu.memory_space<vmem>>, %arg9: memref<1x128xf32, #tpu.memory_space<vmem>>, %arg10: memref<1x8x128xf32, #tpu.memory_space<vmem>>, %arg11: memref<8x256xf32, #tpu.memory_space<vmem>>, %arg12: memref<8x256xf32, #tpu.memory_space<vmem>>, %arg13: memref<8x256xf32, #tpu.memory_space<vmem>>, %arg14: memref<8x256xf32, #tpu.memory_space<vmem>>, %arg15: memref<8x512xbf16, #tpu.memory_space<vmem>>) attributes {dimension_semantics = [#tpu.dimension_semantics<arbitrary>], iteration_bounds = array<i64: 4>, scalar_prefetch = 0 : i64, scratch_operands = 3 : i64, tpu.core_type = #tpu.core_type<tc>, window_params = [{transform_indices = @transform_0, window_bounds = array<i64: 1, 8, 128>}, {pipeline_mode = #tpu.pipeline_mode<synchronous>, transform_indices = @transform_1, window_bounds = array<i64: 8, 256>}, {pipeline_mode = #tpu.pipeline_mode<synchronous>, transform_indices = @transform_2, window_bounds = array<i64: 8, 256>}, {pipeline_mode = #tpu.pipeline_mode<synchronous>, transform_indices = @transform_3, window_bounds = array<i64: 128, 256>}, {pipeline_mode = #tpu.pipeline_mode<synchronous>, transform_indices = @transform_4, window_bounds = array<i64: 1, 256>}, {pipeline_mode = #tpu.pipeline_mode<synchronous>, transform_indices = @transform_5, window_bounds = array<i64: 512, 1024>}, {pipeline_mode = #tpu.pipeline_mode<synchronous>, transform_indices = @transform_6, window_bounds = array<i64: 1, 1024>}, {pipeline_mode = #tpu.pipeline_mode<synchronous>, transform_indices = @transform_7, window_bounds = array<i64: 256, 128>}, {pipeline_mode = #tpu.pipeline_mode<synchronous>, transform_indices = @transform_8, window_bounds = array<i64: 1, 128>}, {transform_indices = @transform_9, window_bounds = array<i64: 1, 8, 128>}, {pipeline_mode = #tpu.pipeline_mode<synchronous>, transform_indices = @transform_10, window_bounds = array<i64: 8, 256>}, {pipeline_mode = #tpu.pipeline_mode<synchronous>, transform_indices = @transform_11, window_bounds = array<i64: 8, 256>}]} {
    %c0_i32 = arith.constant 0 : i32
    %0 = arith.cmpi eq, %arg0, %c0_i32 : i32
    %1 = arith.extui %0 : i1 to i32
    %c0_i32_0 = arith.constant 0 : i32
    %2 = arith.cmpi ne, %1, %c0_i32_0 : i32
    scf.if %2 {
      %c0_40 = arith.constant 0 : index
      %c0_41 = arith.constant 0 : index
      %70 = vector.load %arg2[%c0_40, %c0_41] : memref<8x256xf32, #tpu.memory_space<vmem>>, vector<8x256xf32>
      %c0_42 = arith.constant 0 : index
      %c0_43 = arith.constant 0 : index
      %71 = vector.load %arg13[%c0_42, %c0_43] : memref<8x256xf32, #tpu.memory_space<vmem>>, vector<8x256xf32>
      tpu.vector_store %arg13[%c0_42, %c0_43], %70 {strides = array<i32>} : memref<8x256xf32, #tpu.memory_space<vmem>>, vector<8x256xf32>,
      %c0_44 = arith.constant 0 : index
      %c0_45 = arith.constant 0 : index
      %72 = vector.load %arg3[%c0_44, %c0_45] : memref<8x256xf32, #tpu.memory_space<vmem>>, vector<8x256xf32>
      %c0_46 = arith.constant 0 : index
      %c0_47 = arith.constant 0 : index
      %73 = vector.load %arg14[%c0_46, %c0_47] : memref<8x256xf32, #tpu.memory_space<vmem>>, vector<8x256xf32>
      tpu.vector_store %arg14[%c0_46, %c0_47], %72 {strides = array<i32>} : memref<8x256xf32, #tpu.memory_space<vmem>>, vector<8x256xf32>,
    } else {
    }
    %c0 = arith.constant 0 : index
    %c0_1 = arith.constant 0 : index
    %c0_2 = arith.constant 0 : index
    %3 = vector.load %arg1[%c0, %c0_1, %c0_2] : memref<1x8x128xf32, #tpu.memory_space<vmem>>, vector<1x8x128xf32>
    %4 = vector.shape_cast %3 : vector<1x8x128xf32> to vector<8x128xf32>
    %5 = arith.truncf %4 : vector<8x128xf32> to vector<8x128xbf16>
    %c0_3 = arith.constant 0 : index
    %c0_4 = arith.constant 0 : index
    %6 = vector.load %arg4[%c0_3, %c0_4] : memref<128x256xbf16, #tpu.memory_space<vmem>>, vector<128x256xbf16>
    %cst = arith.constant dense<0.000000e+00> : vector<8x256xf32>
    %7 = tpu.matmul %5, %6, %cst {dimension_numbers = #tpu.dot_dimension_numbers<[1], [0], [0], [1], [0, 0, 1, 1], [], []>} : vector<8x128xbf16>, vector<128x256xbf16>, vector<8x256xf32> -> vector<8x256xf32>
    %c0_5 = arith.constant 0 : index
    %c0_6 = arith.constant 0 : index
    %8 = vector.load %arg5[%c0_5, %c0_6] : memref<1x256xf32, #tpu.memory_space<vmem>>, vector<1x256xf32>
    %9 = vector.broadcast %8 : vector<1x256xf32> to vector<8x256xf32>
    %10 = arith.addf %7, %9 : vector<8x256xf32>
    %cst_7 = arith.constant 0.000000e+00 : f32
    %11 = vector.broadcast %cst_7 : f32 to vector<8x256xf32>
    %12 = arith.cmpf ogt, %10, %11 : vector<8x256xf32>
    %cst_8 = arith.constant 0.000000e+00 : f32
    %13 = vector.broadcast %cst_8 : f32 to vector<8x256xf32>
    %14 = arith.minimumf %10, %13 : vector<8x256xf32>
    %15 = math.exp %14 : vector<8x256xf32>
    %cst_9 = arith.constant 1.000000e+00 : f32
    %16 = vector.broadcast %cst_9 : f32 to vector<8x256xf32>
    %17 = arith.subf %15, %16 : vector<8x256xf32>
    %18 = arith.select %12, %10, %17 : vector<8x256xi1>, vector<8x256xf32>
    %19 = arith.truncf %18 : vector<8x256xf32> to vector<8x256xbf16>
    %c0_10 = arith.constant 0 : index
    %c0_11 = arith.constant 0 : index
    %20 = vector.load %arg15[%c0_10, %c0_11] : memref<8x512xbf16, #tpu.memory_space<vmem>>, vector<8x256xbf16>
    tpu.vector_store %arg15[%c0_10, %c0_11], %19 {strides = array<i32>} : memref<8x512xbf16, #tpu.memory_space<vmem>>, vector<8x256xbf16>,
    %c0_12 = arith.constant 0 : index
    %c0_13 = arith.constant 0 : index
    %21 = vector.load %arg13[%c0_12, %c0_13] : memref<8x256xf32, #tpu.memory_space<vmem>>, vector<8x256xf32>
    %22 = arith.truncf %21 : vector<8x256xf32> to vector<8x256xbf16>
    %c0_14 = arith.constant 0 : index
    %c256 = arith.constant 256 : index
    %23 = vector.load %arg15[%c0_14, %c256] : memref<8x512xbf16, #tpu.memory_space<vmem>>, vector<8x256xbf16>
    tpu.vector_store %arg15[%c0_14, %c256], %22 {strides = array<i32>} : memref<8x512xbf16, #tpu.memory_space<vmem>>, vector<8x256xbf16>,
    %c0_15 = arith.constant 0 : index
    %c0_16 = arith.constant 0 : index
    %24 = vector.load %arg15[%c0_15, %c0_16] : memref<8x512xbf16, #tpu.memory_space<vmem>>, vector<8x512xbf16>
    %c0_17 = arith.constant 0 : index
    %c0_18 = arith.constant 0 : index
    %25 = vector.load %arg6[%c0_17, %c0_18] : memref<512x1024xbf16, #tpu.memory_space<vmem>>, vector<512x1024xbf16>
    %cst_19 = arith.constant dense<0.000000e+00> : vector<8x1024xf32>
    %26 = tpu.matmul %24, %25, %cst_19 {dimension_numbers = #tpu.dot_dimension_numbers<[1], [0], [0], [1], [0, 0, 1, 1], [], []>} : vector<8x512xbf16>, vector<512x1024xbf16>, vector<8x1024xf32> -> vector<8x1024xf32>
    %c0_20 = arith.constant 0 : index
    %c0_21 = arith.constant 0 : index
    %27 = vector.load %arg7[%c0_20, %c0_21] : memref<1x1024xf32, #tpu.memory_space<vmem>>, vector<1x1024xf32>
    %28 = vector.broadcast %27 : vector<1x1024xf32> to vector<8x1024xf32>
    %29 = arith.addf %26, %28 : vector<8x1024xf32>
    %30 = vector.extract_strided_slice %29 {offsets = [0, 0], sizes = [8, 256], strides = [1, 1]} : vector<8x1024xf32> to vector<8x256xf32>
    %31 = arith.negf %30 : vector<8x256xf32>
    %32 = math.exp %31 : vector<8x256xf32>
    %cst_22 = arith.constant 1.000000e+00 : f32
    %33 = vector.broadcast %cst_22 : f32 to vector<8x256xf32>
    %34 = arith.addf %33, %32 : vector<8x256xf32>
    %35 = arith.divf %33, %34 : vector<8x256xf32>
    %36 = vector.extract_strided_slice %29 {offsets = [0, 256], sizes = [8, 256], strides = [1, 1]} : vector<8x1024xf32> to vector<8x256xf32>
    %37 = arith.negf %36 : vector<8x256xf32>
    %38 = math.exp %37 : vector<8x256xf32>
    %cst_23 = arith.constant 1.000000e+00 : f32
    %39 = vector.broadcast %cst_23 : f32 to vector<8x256xf32>
    %40 = arith.addf %39, %38 : vector<8x256xf32>
    %41 = arith.divf %39, %40 : vector<8x256xf32>
    %42 = vector.extract_strided_slice %29 {offsets = [0, 512], sizes = [8, 256], strides = [1, 1]} : vector<8x1024xf32> to vector<8x256xf32>
    %43 = math.tanh %42 : vector<8x256xf32>
    %44 = vector.extract_strided_slice %29 {offsets = [0, 768], sizes = [8, 256], strides = [1, 1]} : vector<8x1024xf32> to vector<8x256xf32>
    %45 = arith.negf %44 : vector<8x256xf32>
    %46 = math.exp %45 : vector<8x256xf32>
    %cst_24 = arith.constant 1.000000e+00 : f32
    %47 = vector.broadcast %cst_24 : f32 to vector<8x256xf32>
    %48 = arith.addf %47, %46 : vector<8x256xf32>
    %49 = arith.divf %47, %48 : vector<8x256xf32>
    %c0_25 = arith.constant 0 : index
    %c0_26 = arith.constant 0 : index
    %50 = vector.load %arg14[%c0_25, %c0_26] : memref<8x256xf32, #tpu.memory_space<vmem>>, vector<8x256xf32>
    %51 = arith.mulf %41, %50 : vector<8x256xf32>
    %52 = arith.mulf %35, %43 : vector<8x256xf32>
    %53 = arith.addf %51, %52 : vector<8x256xf32>
    %54 = math.tanh %53 : vector<8x256xf32>
    %55 = arith.mulf %49, %54 : vector<8x256xf32>
    %c0_27 = arith.constant 0 : index
    %c0_28 = arith.constant 0 : index
    %56 = vector.load %arg13[%c0_27, %c0_28] : memref<8x256xf32, #tpu.memory_space<vmem>>, vector<8x256xf32>
    tpu.vector_store %arg13[%c0_27, %c0_28], %55 {strides = array<i32>} : memref<8x256xf32, #tpu.memory_space<vmem>>, vector<8x256xf32>,
    %c0_29 = arith.constant 0 : index
    %c0_30 = arith.constant 0 : index
    %57 = vector.load %arg14[%c0_29, %c0_30] : memref<8x256xf32, #tpu.memory_space<vmem>>, vector<8x256xf32>
    tpu.vector_store %arg14[%c0_29, %c0_30], %53 {strides = array<i32>} : memref<8x256xf32, #tpu.memory_space<vmem>>, vector<8x256xf32>,
    %58 = arith.truncf %55 : vector<8x256xf32> to vector<8x256xbf16>
    %c0_31 = arith.constant 0 : index
    %c0_32 = arith.constant 0 : index
    %59 = vector.load %arg8[%c0_31, %c0_32] : memref<256x128xbf16, #tpu.memory_space<vmem>>, vector<256x128xbf16>
    %cst_33 = arith.constant dense<0.000000e+00> : vector<8x128xf32>
    %60 = tpu.matmul %58, %59, %cst_33 {dimension_numbers = #tpu.dot_dimension_numbers<[1], [0], [0], [1], [0, 0, 1, 1], [], []>} : vector<8x256xbf16>, vector<256x128xbf16>, vector<8x128xf32> -> vector<8x128xf32>
    %c0_34 = arith.constant 0 : index
    %c0_35 = arith.constant 0 : index
    %61 = vector.load %arg9[%c0_34, %c0_35] : memref<1x128xf32, #tpu.memory_space<vmem>>, vector<1x128xf32>
    %62 = vector.broadcast %61 : vector<1x128xf32> to vector<8x128xf32>
    %63 = arith.addf %60, %62 : vector<8x128xf32>
    %c0_36 = arith.constant 0 : index
    %c0_37 = arith.constant 0 : index
    %c0_38 = arith.constant 0 : index
    %64 = vector.load %arg10[%c0_36, %c0_37, %c0_38] : memref<1x8x128xf32, #tpu.memory_space<vmem>>, vector<1x8x128xf32>
    %65 = vector.shape_cast %64 : vector<1x8x128xf32> to vector<8x128xf32>
    %66 = vector.shape_cast %63 : vector<8x128xf32> to vector<1x8x128xf32>
    tpu.vector_store %arg10[%c0_36, %c0_37, %c0_38], %66 {strides = array<i32>} : memref<1x8x128xf32, #tpu.memory_space<vmem>>, vector<1x8x128xf32>,
    %c3_i32 = arith.constant 3 : i32
    %67 = arith.cmpi eq, %arg0, %c3_i32 : i32
    %68 = arith.extui %67 : i1 to i32
    %c0_i32_39 = arith.constant 0 : i32
    %69 = arith.cmpi ne, %68, %c0_i32_39 : i32
    scf.if %69 {
      %c0_40 = arith.constant 0 : index
      %c0_41 = arith.constant 0 : index
      %70 = vector.load %arg11[%c0_40, %c0_41] : memref<8x256xf32, #tpu.memory_space<vmem>>, vector<8x256xf32>
      tpu.vector_store %arg11[%c0_40, %c0_41], %55 {strides = array<i32>} : memref<8x256xf32, #tpu.memory_space<vmem>>, vector<8x256xf32>,
      %c0_42 = arith.constant 0 : index
      %c0_43 = arith.constant 0 : index
      %71 = vector.load %arg12[%c0_42, %c0_43] : memref<8x256xf32, #tpu.memory_space<vmem>>, vector<8x256xf32>
      tpu.vector_store %arg12[%c0_42, %c0_43], %53 {strides = array<i32>} : memref<8x256xf32, #tpu.memory_space<vmem>>, vector<8x256xf32>,
    } else {
    }
    return
  }
  func.func @transform_0(%arg0: i32) -> (i32, i32, i32) {
    %c0_i32 = arith.constant 0 : i32
    %c0_i32_0 = arith.constant 0 : i32
    %c0_i32_1 = arith.constant 0 : i32
    return %arg0, %c0_i32, %c0_i32_0 : i32, i32, i32
  }
  func.func @transform_1(%arg0: i32) -> (i32, i32) {
    %c0_i32 = arith.constant 0 : i32
    %c0_i32_0 = arith.constant 0 : i32
    %c0_i32_1 = arith.constant 0 : i32
    return %c0_i32, %c0_i32_0 : i32, i32
  }
  func.func @transform_2(%arg0: i32) -> (i32, i32) {
    %c0_i32 = arith.constant 0 : i32
    %c0_i32_0 = arith.constant 0 : i32
    %c0_i32_1 = arith.constant 0 : i32
    return %c0_i32, %c0_i32_0 : i32, i32
  }
  func.func @transform_3(%arg0: i32) -> (i32, i32) {
    %c0_i32 = arith.constant 0 : i32
    %c0_i32_0 = arith.constant 0 : i32
    %c0_i32_1 = arith.constant 0 : i32
    return %c0_i32, %c0_i32_0 : i32, i32
  }
  func.func @transform_4(%arg0: i32) -> (i32, i32) {
    %c0_i32 = arith.constant 0 : i32
    %c0_i32_0 = arith.constant 0 : i32
    %c0_i32_1 = arith.constant 0 : i32
    return %c0_i32, %c0_i32_0 : i32, i32
  }
  func.func @transform_5(%arg0: i32) -> (i32, i32) {
    %c0_i32 = arith.constant 0 : i32
    %c0_i32_0 = arith.constant 0 : i32
    %c0_i32_1 = arith.constant 0 : i32
    return %c0_i32, %c0_i32_0 : i32, i32
  }
  func.func @transform_6(%arg0: i32) -> (i32, i32) {
    %c0_i32 = arith.constant 0 : i32
    %c0_i32_0 = arith.constant 0 : i32
    %c0_i32_1 = arith.constant 0 : i32
    return %c0_i32, %c0_i32_0 : i32, i32
  }
  func.func @transform_7(%arg0: i32) -> (i32, i32) {
    %c0_i32 = arith.constant 0 : i32
    %c0_i32_0 = arith.constant 0 : i32
    %c0_i32_1 = arith.constant 0 : i32
    return %c0_i32, %c0_i32_0 : i32, i32
  }
  func.func @transform_8(%arg0: i32) -> (i32, i32) {
    %c0_i32 = arith.constant 0 : i32
    %c0_i32_0 = arith.constant 0 : i32
    %c0_i32_1 = arith.constant 0 : i32
    return %c0_i32, %c0_i32_0 : i32, i32
  }
  func.func @transform_9(%arg0: i32) -> (i32, i32, i32) {
    %c0_i32 = arith.constant 0 : i32
    %c0_i32_0 = arith.constant 0 : i32
    %c0_i32_1 = arith.constant 0 : i32
    return %arg0, %c0_i32, %c0_i32_0 : i32, i32, i32
  }
  func.func @transform_10(%arg0: i32) -> (i32, i32) {
    %c0_i32 = arith.constant 0 : i32
    %c0_i32_0 = arith.constant 0 : i32
    %c0_i32_1 = arith.constant 0 : i32
    return %c0_i32, %c0_i32_0 : i32, i32
  }
  func.func @transform_11(%arg0: i32) -> (i32, i32) {
    %c0_i32 = arith.constant 0 : i32
    %c0_i32_0 = arith.constant 0 : i32
    %c0_i32_1 = arith.constant 0 : i32
    return %c0_i32, %c0_i32_0 : i32, i32
  }
}

</mosaic_0001>

<bundles_post_ra>
// kernel: tpu_custom_call.1
= control target key start
LH: loop header
LB: loop body
LE: loop exit
PB: predicated region body
PF: predicated region fallthrough
CT: control target
= control target key end

     0   :  { %s4233_s0 = inlined_call_operand.vmem [shape: f32[4,8,128], index: 0, kind: input, shape index: {}]   ;;  %s4234_s1 = inlined_call_operand.hbm [shape: f32[8,256], index: 1, kind: input, shape index: {}, may-alias: {1,10}]   ;;  %s4235_s2 = inlined_call_operand.hbm [shape: f32[8,256], index: 2, kind: input, shape index: {}, may-alias: {2,11}]   ;;  %s4236_s3 = inlined_call_operand.hbm [shape: bf16[128,256], index: 3, kind: input, shape index: {}]   ;;  %s4237_s4 = inlined_call_operand.vmem [shape: f32[1,256], index: 4, kind: input, shape index: {}]   ;;  %s4238_s5 = inlined_call_operand.hbm [shape: bf16[512,1024], index: 5, kind: input, shape index: {}]   ;;  %s4239_s6 = inlined_call_operand.vmem [shape: f32[1,1024], index: 6, kind: input, shape index: {}]   ;;  %s4240_s7 = inlined_call_operand.hbm [shape: bf16[256,128], index: 7, kind: input, shape index: {}]   ;;  %s4241_s8 = inlined_call_operand.vmem [shape: f32[1,128], index: 8, kind: input, shape index: {}]   ;;  %s4242_s9 = inlined_call_operand.hbm [shape: f32[4,8,128], index: 9, kind: output, shape index: {0}]   ;;  %s4243_s10 = inlined_call_operand.hbm [shape: f32[8,256], index: 10, kind: output, shape index: {1}, may-alias: {1,10}]   ;;  %s4244_s11 = inlined_call_operand.hbm [shape: f32[8,256], index: 11, kind: output, shape index: {2}, may-alias: {2,11}]  }
   0x1   :  { %4254 = sst [smem:[#allocation28_spill]] %s4234_s1 }
   0x2   :  { %4255 = sst [smem:[#allocation29_spill]] %s4235_s2 }
   0x3   :  { %17 = vsyncpa [#allocation6], 0 }
   0x4   :  { %18 = vsyncpa [#allocation9], 0 }
   0x5   :  { %19 = vsyncpa [#allocation12], 0 }
   0x6   :  { %20 = vsyncpa [#allocation7], 0 }
   0x7   :  { %22 = vsyncpa [#allocation7 + $0x1], 0 }
   0x8   :  { %23 = vsyncpa [#allocation16], 0  ;;  %s3886_s17 = smov 0   ;;  %s3888_s18 = smov 0  }
   0x9   :  { %s3890_s19 = smov 0   ;;  %s3892_s20 = smov 0  }
   0xa LB: > { %4256 = sst [smem:[#allocation23_spill]] %s3797_s17  ;;  %s3907_s21 = sadd.s32 4294967295, %s3809_s20   ;;  %s3809_s20 = sphi %s3892_s20, %s4288_s20   ;;  %s3805_s19 = sphi %s3890_s19, %s4290_s19   ;;  %s3801_s18 = sphi %s3888_s18, %s4292_s18   ;;  %s3797_s17 = sphi %s3886_s17, %s4291_s17  }
   0xb   : > { %4257 = sst [smem:[#allocation24_spill]] %s3805_s19  ;;  %s2971_s22 = sadd.s32 4294967294, %s3809_s20  }
   0xc   : > { %s3911_s23 = sadd.s32 1, %s3809_s20   ;;  %s230_s24 = sadd.s32 1, %s3805_s19 }
   0xd   : > { %4258 = sst [smem:[#allocation25_spill]] %s3911_s23  ;;  %s227_s25 = ssub.s32 %s3809_s20, %s3911_s23 }
   0xe   : > { %p240_p0 = scmp.ne.s32.totalorder %s3805_s19, %s3801_s18  ;;  %p228_p1 = scmp.eq.s32.totalorder %s227_s25, 0 }
   0xf   : > { %p4248_p2 = scmp.eq.s32.totalorder %s3907_s21, 3  ;;  %p246_p3 = scmp.ne.s32.totalorder %s3801_s18, %s3797_s17 }
  0x10   : > { %p247_p4 = scmp.eq.s32.totalorder %s2971_s22, 3  ;;  %p2972_p7 = scmp.ge.s32.totalorder %s3809_s20, 1 }
  0x11   : > { %s3922_s26 = scalar_select %p228_p1, %s3805_s19, %s230_s24  }
  0x12   : > { %p3926_p5 = por %p4248_p2, %p240_p0  ;;  %p3930_p6 = por %p247_p4, %p246_p3 }
  0x13   : > { %4259 = sst [smem:[#allocation26_spill]] %s3922_s26  ;;  %p296_p8 = scmp.lt.s32.totalorder %s3809_s20, 5 }
  0x14   : > { %s4260_s27 = scalar_select %p3926_p5, 1, 0 }
  0x15   : > { %s4261_s28 = scalar_select %p3930_p6, 1, 0 }
  0x16   : > { %p4249_p10 = scmp.eq.s32.totalorder %s3907_s21, 0  ;;  %p3938_p11 = pnand %p2972_p7, %p296_p8 }
  0x17   : > { %4262 = sst [smem:[#allocation27_spill]] %s4261_s28  ;;  %s3811_s30 = smov [#allocation8]  }
  0x18   : > { %s4263_s29 = scalar_select %p3938_p11, 1, 0 }
  0x19   : > { %s320_s12 = sshll.u32 %s3811_s30, 4  ;;  %p3382_p12 = pneg %p3938_p11  ;;  %s321_s12 = int_to_ptr.vmem [resolvable:$true] %s320_s12 }
  0x1a   : > { %s3812_s13 = smov [#allocation11]   ;;  %s3813_s16 = smov [#allocation5]  }
  0x1b   : > { %s346_s14 = sshll.u32 %s3812_s13, 4  ;;  %p3946_p13 = pnand %p4249_p10, %p3382_p12  ;;  %s3950_s14 = int_to_ptr.vmem [resolvable:$true] %s346_s14 }
  0x1c   : > { %s3952_s22 = sshll.u32 %s3813_s16, 4  ;;  %s4265_s2 = sld [smem:[#allocation29_spill]]  ;;  %s310_s22 = int_to_ptr.vmem [resolvable:$true] %s3952_s22 }
  0x1d   : > { %p3962_p1 = pneg %p3946_p13 }
  0x22   : > { %s3539_s30 = scalar_lea.hbm %s4265_s2, 256 }
  0x23   : > { %p3540_p0 = scmp.ne.s32.totalorder %s4265_s2, %s3539_s30  ;;  %p3546_p7 = scmp.lt.u32.totalorder %s3539_s30, %s4265_s2 }
  0x25   : > { %p3542_p3 = pnand %p3962_p1, %p3540_p0 }
  0x27   : > { %p3543_p4 = pneg %p3542_p3 }
  0x29   : > { %p3548_p8 = pnand %p3546_p7, %p3543_p4 }
  0x2b   : > { %3551 = shalt.err (!%p3548_p8)
}
  0x2c   : > { %s3552_s24 = scalar_lea.vmem %s321_s12, 256  ;;  %p3560_p10 = scmp.lt.s32.totalorder %s321_s12, %s321_s12 }
  0x2d   : > { %p3553_p12 = scmp.ne.s32.totalorder %s321_s12, %s3552_s24  ;;  %p3561_p6 = scmp.lt.s32.totalorder %s3552_s24, %s3552_s24 }
  0x2f   : > { %p3555_p2 = pnand %p3553_p12, %p3962_p1  ;;  %p3562_p5 = por %p3561_p6, %p3560_p10 }
  0x31   : > { %p3556_p9 = pneg %p3555_p2 }
  0x33   : > { %p3563_p11 = pnand %p3562_p5, %p3556_p9 }
  0x35   : > { %3566 = shalt.err (!%p3563_p11)
}
  0x36   : > { %3388 = dma.hbm_to_vmem [thread:$0]  (!%p3946_p13), %s4265_s2, 256, %s321_s12, [#allocation9]  }
  0x37   : > { %s3567_s30 = scalar_lea.hbm %s4238_s5, 32768 }
  0x38   : > { %p3568_p2 = scmp.ne.s32.totalorder %s4238_s5, %s3567_s30  ;;  %p3574_p5 = scmp.lt.u32.totalorder %s3567_s30, %s4238_s5 }
  0x3a   : > { %p3570_p0 = pnand %p3568_p2, %p3962_p1 }
  0x3c   : > { %p3571_p6 = pneg %p3570_p0 }
  0x3e   : > { %p3576_p9 = pnand %p3574_p5, %p3571_p6 }
  0x40   : > { %3579 = shalt.err (!%p3576_p9)
}
  0x41   : > { %s3580_s12 = scalar_lea.vmem %s3950_s14, 32768  ;;  %p3588_p4 = scmp.lt.s32.totalorder %s3950_s14, %s3950_s14 }
  0x42   : > { %p3581_p10 = scmp.ne.s32.totalorder %s3950_s14, %s3580_s12  ;;  %p3589_p7 = scmp.lt.s32.totalorder %s3580_s12, %s3580_s12 }
  0x44   : > { %p3583_p11 = pnand %p3581_p10, %p3962_p1  ;;  %p3590_p8 = por %p3589_p7, %p3588_p4 }
  0x46   : > { %p3584_p3 = pneg %p3583_p11 }
  0x48   : > { %p3591_p12 = pnand %p3590_p8, %p3584_p3 }
  0x4a   : > { %3594 = shalt.err (!%p3591_p12)
}
  0x4b   : > { %s3814_s28 = smov 512   ;;  %s3815_s17 = smov 32  }
  0x4c   : > { %3394 = dma.hbm_to_vmem [thread:$0]  (!%p3946_p13), %s4238_s5, 32768, %s3950_s14, [#allocation12], %s3814_s28, %s3814_s28, %s3815_s17  }
  0x4d   : > { %s4267_s1 = sld [smem:[#allocation28_spill]] }
  0x53   : > { %s3595_s30 = scalar_lea.hbm %s4267_s1, 256 }
  0x54   : > { %p3596_p2 = scmp.ne.s32.totalorder %s4267_s1, %s3595_s30  ;;  %p3602_p5 = scmp.lt.u32.totalorder %s3595_s30, %s4267_s1 }
  0x56   : > { %p3598_p0 = pnand %p3596_p2, %p3962_p1 }
  0x58   : > { %p3599_p6 = pneg %p3598_p0 }
  0x5a   : > { %p3604_p9 = pnand %p3602_p5, %p3599_p6 }
  0x5c   : > { %3607 = shalt.err (!%p3604_p9)
}
  0x5d   : > { %s3608_s19 = scalar_lea.vmem %s310_s22, 256  ;;  %p3616_p4 = scmp.lt.s32.totalorder %s310_s22, %s310_s22 }
  0x5e   : > { %p3609_p10 = scmp.ne.s32.totalorder %s310_s22, %s3608_s19  ;;  %p3617_p7 = scmp.lt.s32.totalorder %s3608_s19, %s3608_s19 }
  0x60   : > { %p3611_p11 = pnand %p3609_p10, %p3962_p1  ;;  %p3618_p8 = por %p3617_p7, %p3616_p4 }
  0x62   : > { %p3612_p3 = pneg %p3611_p11 }
  0x64   : > { %p3619_p12 = pnand %p3618_p8, %p3612_p3 }
  0x66   : > { %3622 = shalt.err (!%p3619_p12)
}
  0x67   : > { %3385 = dma.hbm_to_vmem [thread:$0]  (!%p3946_p13), %s4267_s1, 256, %s310_s22, [#allocation6]  }
  0x68   : > { %s3816_s2 = smov [#allocation10]   ;;  %s3623_s25 = scalar_lea.hbm %s4236_s3, 2048 }
  0x69   : > { %s330_s17 = sshll.u32 %s3816_s2, 4  ;;  %p3624_p2 = scmp.ne.s32.totalorder %s4236_s3, %s3623_s25  ;;  %s331_s17 = int_to_ptr.vmem [resolvable:$true] %s330_s17 }
  0x6a   : > { %p3630_p5 = scmp.lt.u32.totalorder %s3623_s25, %s4236_s3 }
  0x6b   : > { %p3626_p0 = pnand %p3624_p2, %p3962_p1 }
  0x6d   : > { %p3627_p6 = pneg %p3626_p0 }
  0x6f   : > { %p3632_p9 = pnand %p3630_p5, %p3627_p6 }
  0x71   : > { %3635 = shalt.err (!%p3632_p9)
}
  0x72   : > { %s3636_s22 = scalar_lea.vmem %s331_s17, 2048  ;;  %p3644_p4 = scmp.lt.s32.totalorder %s331_s17, %s331_s17 }
  0x73   : > { %p3637_p10 = scmp.ne.s32.totalorder %s331_s17, %s3636_s22  ;;  %p3645_p7 = scmp.lt.s32.totalorder %s3636_s22, %s3636_s22 }
  0x75   : > { %p3639_p11 = pnand %p3637_p10, %p3962_p1  ;;  %p3646_p8 = por %p3645_p7, %p3644_p4 }
  0x77   : > { %p3640_p3 = pneg %p3639_p11 }
  0x79   : > { %p3647_p12 = pnand %p3646_p8, %p3640_p3 }
  0x7b   : > { %3650 = shalt.err (!%p3647_p12)
}
  0x7c   : > { %s3817_s19 = smov 128   ;;  %s3818_s14 = smov 8  }
  0x7d   : > { %3391 = dma.hbm_to_vmem [thread:$0]  (!%p3946_p13), %s4236_s3, 2048, %s331_s17, [#allocation9], %s3817_s19, %s3817_s19, %s3818_s14  }
  0x7e   : > { %s3819_s26 = smov [#allocation13]   ;;  %s3651_s16 = scalar_lea.hbm %s4240_s7, 2048 }
  0x7f   : > { %s362_s23 = sshll.u32 %s3819_s26, 4  ;;  %p3652_p2 = scmp.ne.s32.totalorder %s4240_s7, %s3651_s16  ;;  %s363_s23 = int_to_ptr.vmem [resolvable:$true] %s362_s23 }
  0x80   : > { %p3658_p5 = scmp.lt.u32.totalorder %s3651_s16, %s4240_s7 }
  0x81   : > { %p3654_p0 = pnand %p3652_p2, %p3962_p1 }
  0x83   : > { %p3655_p6 = pneg %p3654_p0 }
  0x85   : > { %p3660_p9 = pnand %p3658_p5, %p3655_p6 }
  0x87   : > { %3663 = shalt.err (!%p3660_p9)
}
  0x88   : > { %s3664_s17 = scalar_lea.vmem %s363_s23, 2048  ;;  %p3672_p4 = scmp.lt.s32.totalorder %s363_s23, %s363_s23 }
  0x89   : > { %p3665_p10 = scmp.ne.s32.totalorder %s363_s23, %s3664_s17  ;;  %p3673_p7 = scmp.lt.s32.totalorder %s3664_s17, %s3664_s17 }
  0x8b   : > { %p3667_p11 = pnand %p3665_p10, %p3962_p1  ;;  %p3674_p8 = por %p3673_p7, %p3672_p4 }
  0x8d   : > { %p3668_p3 = pneg %p3667_p11 }
  0x8f   : > { %p3675_p12 = pnand %p3674_p8, %p3668_p3 }
  0x91   : > { %3678 = shalt.err (!%p3675_p12)
}
  0x92   : > { %s3820_s19 = smov 64   ;;  %s3821_s14 = smov 4  }
  0x93   : > { %3397 = dma.hbm_to_vmem [thread:$0]  (!%p3946_p13), %s4240_s7, 2048, %s363_s23, [#allocation12], %s3820_s19, %s3820_s19, %s3821_s14  }
  0x94   : > { %p4268_p2 = scmp.ne.s32.totalorder %s4263_s29, 0 }
  0x95   : > { %p4269_p0 = scmp.eq.s32.totalorder (!%p4268_p2), %s3907_s21, 0 }
  0x96   : > { %388 = sbr.rel (%p4268_p2) target bundleno = 1177 (0x499), region = 56 }
  0x9d   : > { %3776 = dma.done.wait (%p4269_p0), [#allocation6], 256   ;;  %p4270_p1 = pmov %p4269_p0 }
  0x9e   : > { %p4271_p6 = pmov %p4269_p0 }
  0x9f   : > { %3778 = vsyncadd (%p4270_p1), [#allocation6], 4294967040 }
  0xa0   : > { %3780 = dma.done.wait (%p4271_p6), [#allocation9], 2304   ;;  %p4272_p5 = pmov %p4269_p0 }
  0xa1   : > { %p4273_p9 = pmov %p4269_p0 }
  0xa2   : > { %3782 = vsyncadd (%p4272_p5), [#allocation9], 4294964992 }
  0xa3   : > { %3784 = dma.done.wait (%p4273_p9), [#allocation12], 34816   ;;  %p4274_p13 = pmov %p4269_p0 }
  0xa4   : > { %s436_s29 = sand.u32 1, %s3801_s18   ;;  %p443_p10 = scmp.lt.s32.totalorder %s3907_s21, 3 }
  0xa5   : > { %3786 = vsyncadd (%p4274_p13), [#allocation12], 4294932480  ;;  %s4074_s15 = sshll.u32 %s436_s29, 3  ;;  %p4275_p11 = scmp.ne.s32.totalorder %s3907_s21, 0 }
  0xa6   : > { %s444_s13 = scalar_select %p443_p10, %s3907_s21, 3 }
  0xa7   : > { %s438_s30 = scalar_lea.vmem [#allocation14], %s4074_s15  ;;  %451 = sbr.rel (%p4275_p11) target bundleno = 174 (0xae), region = 80  ;;  %v452_v0 = vld [vmem:[#allocation5] sm:$0xff] (!%p4275_p11)  ;;  %v453_v1 = vld [vmem:[#allocation5 + $0x8] sm:$0xff] (!%p4275_p11)  ;;  %v456_v2 = vld [vmem:[#allocation8] sm:$0xff] (!%p4275_p11) }
  0xa8   : > { %s2986_s2 = sshll.u32 %s444_s13, 3  ;;  %454 = vst [vmem:[#allocation2] sm:$0xff] (!%p4275_p11), %v452_v0  ;;  %455 = vst [vmem:[#allocation2 + $0x8] sm:$0xff] (!%p4275_p11), %v453_v1  ;;  %v457_v3 = vld [vmem:[#allocation8 + $0x8] sm:$0xff] (!%p4275_p11) }
  0xa9   : > { %s4080_s25 = scalar_lea.vmem %s4233_s0, %s2986_s2  ;;  %458 = vst [vmem:[#allocation3] sm:$0xff] (!%p4275_p11), %v456_v2  ;;  %459 = vst [vmem:[#allocation3 + $0x8] sm:$0xff] (!%p4275_p11), %v457_v3 }
  0xae PF: > { %v3463_v4 = vld [vmem:[#allocation10 + $0x4] ss:$8 sps:$4 sm:$0xff]   ;;  %v3465_v5 = vld [vmem:[#allocation10] ss:$8 sps:$4 sm:$0xff]   ;;  %v3822_v6 = vmov 0   ;;  %p3291_p3 = scmp.ne.s32.totalorder %s3907_s21, 3 }
  0xaf   : > { %602 = vmatprep.mubr.bf16.mxu0 %v3822_v6  ;;  %570 = vmatprep.subr.bf16.mxu0 %v3463_v4  ;;  %v3466_v7 = vld [vmem:[#allocation10 + $0x14] ss:$8 sps:$4 sm:$0xff]   ;;  %v3468_v8 = vld [vmem:[#allocation10 + $0x10] ss:$8 sps:$4 sm:$0xff]   ;;  %v3469_v9 = vld [vmem:[#allocation10 + $0x24] ss:$8 sps:$4 sm:$0xff]  }
  0xb0   : > { %571 = vmatpush1.bf16.msra.mxu0 %v3465_v5  ;;  %v3471_v10 = vld [vmem:[#allocation10 + $0x20] ss:$8 sps:$4 sm:$0xff]   ;;  %v3472_v11 = vld [vmem:[#allocation10 + $0x34] ss:$8 sps:$4 sm:$0xff]   ;;  %v3474_v12 = vld [vmem:[#allocation10 + $0x30] ss:$8 sps:$4 sm:$0xff]  }
  0xb1   : > { %572 = vmatprep.subr.bf16.mxu0 %v3466_v7  ;;  %v645_v13 = vld [vmem:[#allocation11] sm:$0xff]  ;;  %v3478_v25 = vld [vmem:[#allocation10 + $0x54] ss:$8 sps:$4 sm:$0xff]   ;;  %v3480_v29 = vld [vmem:[#allocation10 + $0x50] ss:$8 sps:$4 sm:$0xff]  }
  0xb2   : > { %v649_v14 = vld [vmem:[#allocation11 + $0x20] sm:$0xff]  ;;  %v3484_v36 = vld [vmem:[#allocation10 + $0x74] ss:$8 sps:$4 sm:$0xff]   ;;  %v646_v37 = vld [vmem:[#allocation11 + $0x8] sm:$0xff] }
  0xb3   : > { %v3475_v15 = vld [vmem:[#allocation10 + $0x44] ss:$8 sps:$4 sm:$0xff]   ;;  %v3013_v16 = vcombine.high %v645_v13, %v649_v14  ;;  %v3012_v17 = vcombine.low %v645_v13, %v649_v14  ;;  %v3477_v23 = vld [vmem:[#allocation10 + $0x40] ss:$8 sps:$4 sm:$0xff]   ;;  %v3486_v43 = vld [vmem:[#allocation10 + $0x70] ss:$8 sps:$4 sm:$0xff]  }
  0xb4   : > { %573 = vmatpush1.bf16.msra.mxu0 %v3468_v8  ;;  %v653_v18 = vld [vmem:[#allocation11 + $0x40] sm:$0xff]  ;;  %v650_v38 = vld [vmem:[#allocation11 + $0x28] sm:$0xff] }
  0xb5   : > { %574 = vmatprep.subr.bf16.mxu0 %v3469_v9  ;;  %v657_v19 = vld [vmem:[#allocation11 + $0x60] sm:$0xff]  ;;  %2237 = vmatprep.subr.bf16.mxu1 %v3013_v16  ;;  %v654_v45 = vld [vmem:[#allocation11 + $0x48] sm:$0xff]  ;;  %v3015_v50 = vcombine.high %v646_v37, %v650_v38  ;;  %v3014_v53 = vcombine.low %v646_v37, %v650_v38 }
  0xb6   : > { %v3021_v20 = vcombine.high %v653_v18, %v657_v19  ;;  %v661_v21 = vld [vmem:[#allocation11 + $0x80] sm:$0xff]  ;;  %2238 = vmatpush1.bf16.msra.mxu1 %v3012_v17  ;;  %v3020_v24 = vcombine.low %v653_v18, %v657_v19  ;;  %v658_v46 = vld [vmem:[#allocation11 + $0x68] sm:$0xff] }
  0xb7   : > { %v665_v22 = vld [vmem:[#allocation11 + $0xa0] sm:$0xff]  ;;  %v662_v54 = vld [vmem:[#allocation11 + $0x88] sm:$0xff]  ;;  %v3023_v59 = vcombine.high %v654_v45, %v658_v46  ;;  %v3022_v61 = vcombine.low %v654_v45, %v658_v46 }
  0xb8   : > { %575 = vmatpush1.bf16.msra.mxu0 %v3471_v10  ;;  %2239 = vmatprep.subr.bf16.mxu1 %v3021_v20  ;;  %v3029_v26 = vcombine.high %v661_v21, %v665_v22  ;;  %v669_v27 = vld [vmem:[#allocation11 + $0xc0] sm:$0xff]  ;;  %v3028_v30 = vcombine.low %v661_v21, %v665_v22  ;;  %v666_v55 = vld [vmem:[#allocation11 + $0xa8] sm:$0xff] }
  0xb9   : > { %576 = vmatprep.subr.bf16.mxu0 %v3472_v11  ;;  %v673_v28 = vld [vmem:[#allocation11 + $0xe0] sm:$0xff]  ;;  %v3031_v63 = vcombine.high %v662_v54, %v666_v55  ;;  %v670_v0 = vld [vmem:[#allocation11 + $0xc8] sm:$0xff]  ;;  %v3030_v5 = vcombine.low %v662_v54, %v666_v55 }
  0xba   : > { %2240 = vmatpush1.bf16.msra.mxu1 %v3020_v24  ;;  %v3481_v31 = vld [vmem:[#allocation10 + $0x64] ss:$8 sps:$4 sm:$0xff]   ;;  %v3037_v32 = vcombine.high %v669_v27, %v673_v28  ;;  %v3483_v35 = vld [vmem:[#allocation10 + $0x60] ss:$8 sps:$4 sm:$0xff]   ;;  %v3036_v39 = vcombine.low %v669_v27, %v673_v28 }
  0xbb   : > { %2241 = vmatprep.subr.bf16.mxu1 %v3029_v26  ;;  %v677_v33 = vld [vmem:[#allocation11 + $0x100] sm:$0xff]  ;;  %v674_v2 = vld [vmem:[#allocation11 + $0xe8] sm:$0xff] }
  0xbc   : > { %577 = vmatpush1.bf16.msra.mxu0 %v3474_v12  ;;  %v681_v34 = vld [vmem:[#allocation11 + $0x120] sm:$0xff]  ;;  %v3039_v7 = vcombine.high %v670_v0, %v674_v2  ;;  %v678_v8 = vld [vmem:[#allocation11 + $0x108] sm:$0xff]  ;;  %v3038_v13 = vcombine.low %v670_v0, %v674_v2 }
  0xbd   : > { %578 = vmatprep.subr.bf16.mxu0 %v3475_v15  ;;  %v3045_v40 = vcombine.high %v677_v33, %v681_v34  ;;  %v685_v41 = vld [vmem:[#allocation11 + $0x140] sm:$0xff]  ;;  %v3044_v47 = vcombine.low %v677_v33, %v681_v34  ;;  %v682_v10 = vld [vmem:[#allocation11 + $0x128] sm:$0xff] }
  0xbe   : > { %2242 = vmatpush1.bf16.msra.mxu1 %v3028_v30  ;;  %v689_v42 = vld [vmem:[#allocation11 + $0x160] sm:$0xff]  ;;  %v3047_v15 = vcombine.high %v678_v8, %v682_v10  ;;  %v686_v17 = vld [vmem:[#allocation11 + $0x148] sm:$0xff]  ;;  %v3046_v19 = vcombine.low %v678_v8, %v682_v10 }
  0xbf   : > { %2243 = vmatprep.subr.bf16.mxu1 %v3037_v32  ;;  %v460_v44 = vld [vmem:[%s4080_s25] sm:$0xff]  ;;  %v3053_v51 = vcombine.high %v685_v41, %v689_v42  ;;  %v3052_v56 = vcombine.low %v685_v41, %v689_v42  ;;  %v690_v18 = vld [vmem:[#allocation11 + $0x168] sm:$0xff] }
  0xc0   : > { %579 = vmatpush1.bf16.msra.mxu0 %v3477_v23  ;;  %v693_v48 = vld [vmem:[#allocation11 + $0x180] sm:$0xff]  ;;  %v461_v52 = vpack.c.bf16 %v460_v44, %v460_v44  ;;  %v3055_v21 = vcombine.high %v686_v17, %v690_v18  ;;  %v694_v22 = vld [vmem:[#allocation11 + $0x188] sm:$0xff]  ;;  %v3054_v24 = vcombine.low %v686_v17, %v690_v18 }
  0xc1   : > { %580 = vmatprep.subr.bf16.mxu0 %v3478_v25  ;;  %v697_v49 = vld [vmem:[#allocation11 + $0x1a0] sm:$0xff]  ;;  %v698_v23 = vld [vmem:[#allocation11 + $0x1a8] sm:$0xff] }
  0xc2   : > { %2244 = vmatpush1.bf16.msra.mxu1 %v3036_v39  ;;  %v701_v57 = vld [vmem:[#allocation11 + $0x1c0] sm:$0xff]  ;;  %v3061_v60 = vcombine.high %v693_v48, %v697_v49  ;;  %v3060_v62 = vcombine.low %v693_v48, %v697_v49  ;;  %v3063_v25 = vcombine.high %v694_v22, %v698_v23  ;;  %v702_v26 = vld [vmem:[#allocation11 + $0x1c8] sm:$0xff]  ;;  %v3062_v28 = vcombine.low %v694_v22, %v698_v23 }
  0xc3   : > { %2245 = vmatprep.subr.bf16.mxu1 %v3045_v40  ;;  %v705_v58 = vld [vmem:[#allocation11 + $0x1e0] sm:$0xff]  ;;  %v706_v27 = vld [vmem:[#allocation11 + $0x1e8] sm:$0xff] }
  0xc4   : > { %581 = vmatpush1.bf16.msra.mxu0 %v3480_v29  ;;  %v3069_v1 = vcombine.high %v701_v57, %v705_v58  ;;  %v709_v3 = vld [vmem:[#allocation11 + $0x200] sm:$0xff]  ;;  %v3068_v6 = vcombine.low %v701_v57, %v705_v58  ;;  %v3071_v29 = vcombine.high %v702_v26, %v706_v27  ;;  %v710_v30 = vld [vmem:[#allocation11 + $0x208] sm:$0xff]  ;;  %v3070_v32 = vcombine.low %v702_v26, %v706_v27 }
  0xc5   : > { %582 = vmatprep.subr.bf16.mxu0 %v3481_v31  ;;  %v713_v4 = vld [vmem:[#allocation11 + $0x220] sm:$0xff]  ;;  %v714_v31 = vld [vmem:[#allocation11 + $0x228] sm:$0xff] }
  0xc6   : > { %2246 = vmatpush1.bf16.msra.mxu1 %v3044_v47  ;;  %v3077_v9 = vcombine.high %v709_v3, %v713_v4  ;;  %v717_v11 = vld [vmem:[#allocation11 + $0x240] sm:$0xff]  ;;  %v3076_v14 = vcombine.low %v709_v3, %v713_v4  ;;  %v3079_v33 = vcombine.high %v710_v30, %v714_v31  ;;  %v718_v34 = vld [vmem:[#allocation11 + $0x248] sm:$0xff] }
  0xc7   : > { %2247 = vmatprep.subr.bf16.mxu1 %v3053_v51  ;;  %v721_v12 = vld [vmem:[#allocation11 + $0x260] sm:$0xff]  ;;  %v726_v41 = vld [vmem:[#allocation11 + $0x288] sm:$0xff] }
  0xc8   : > { %583 = vmatpush1.bf16.msra.mxu0 %v3483_v35  ;;  %v3085_v16 = vcombine.high %v717_v11, %v721_v12  ;;  %v3084_v20 = vcombine.low %v717_v11, %v721_v12  ;;  %v722_v35 = vld [vmem:[#allocation11 + $0x268] sm:$0xff]  ;;  %v725_v39 = vld [vmem:[#allocation11 + $0x280] sm:$0xff] }
  0xc9   : > { %584 = vmatprep.subr.bf16.mxu0 %v3484_v36  ;;  %v3078_v36 = vcombine.low %v710_v30, %v714_v31  ;;  %v3087_v37 = vcombine.high %v718_v34, %v722_v35  ;;  %v3086_v38 = vcombine.low %v718_v34, %v722_v35  ;;  %v729_v40 = vld [vmem:[#allocation11 + $0x2a0] sm:$0xff]  ;;  %v734_v49 = vld [vmem:[#allocation11 + $0x2c8] sm:$0xff]  ;;  %v480_v31 = vlaneseq }
  0xca   : > { %2248 = vmatpush1.bf16.msra.mxu1 %v3052_v56  ;;  %v3093_v42 = vcombine.high %v725_v39, %v729_v40  ;;  %v3092_v46 = vcombine.low %v725_v39, %v729_v40  ;;  %v733_v47 = vld [vmem:[#allocation11 + $0x2c0] sm:$0xff]  ;;  %v738_v51 = vld [vmem:[#allocation11 + $0x2e8] sm:$0xff] }
  0xcb   : > { %2249 = vmatprep.subr.bf16.mxu1 %v3061_v60  ;;  %v737_v48 = vld [vmem:[#allocation11 + $0x2e0] sm:$0xff]  ;;  %v742_v57 = vld [vmem:[#allocation11 + $0x308] sm:$0xff] }
  0xcc   : > { %585 = vmatpush1.bf16.msra.mxu0 %v3486_v43  ;;  %v730_v43 = vld [vmem:[#allocation11 + $0x2a8] sm:$0xff]  ;;  %v3100_v54 = vcombine.low %v733_v47, %v737_v48  ;;  %v741_v55 = vld [vmem:[#allocation11 + $0x300] sm:$0xff] }
  0xcd   : > { %2319 = vmatprep.subr.bf16.mxu0 %v3015_v50  ;;  %v3094_v44 = vcombine.low %v726_v41, %v730_v43  ;;  %v3095_v45 = vcombine.high %v726_v41, %v730_v43  ;;  %v3101_v50 = vcombine.high %v733_v47, %v737_v48  ;;  %v745_v56 = vld [vmem:[#allocation11 + $0x320] sm:$0xff]  ;;  %v754_v3 = vld [vmem:[#allocation11 + $0x368] sm:$0xff] }
  0xce   : > { %2250 = vmatpush1.bf16.msra.mxu1 %v3060_v62  ;;  %v3109_v58 = vcombine.high %v741_v55, %v745_v56  ;;  %v3108_v62 = vcombine.low %v741_v55, %v745_v56  ;;  %v753_v0 = vld [vmem:[#allocation11 + $0x360] sm:$0xff]  ;;  %v762_v11 = vld [vmem:[#allocation11 + $0x3a8] sm:$0xff] }
  0xcf   : > { %603 = vmatmul.mubr.bf16.vlgmr.msra.gmra.mrb[0].mxu0 %v461_v52  ;;  %2251 = vmatprep.subr.bf16.mxu1 %v3069_v1  ;;  %v3102_v52 = vcombine.low %v734_v49, %v738_v51  ;;  %v750_v1 = vld [vmem:[#allocation11 + $0x348] sm:$0xff]  ;;  %v761_v8 = vld [vmem:[#allocation11 + $0x3a0] sm:$0xff] }
  0xd0   : > { %2320 = vmatpush1.bf16.msra.mxu0 %v3014_v53  ;;  %v3103_v53 = vcombine.high %v734_v49, %v738_v51  ;;  %v3118_v4 = vcombine.low %v750_v1, %v754_v3  ;;  %v766_v17 = vld [vmem:[#allocation11 + $0x3c8] sm:$0xff]  ;;  %v773_v23 = vld [vmem:[#allocation11 + $0x400] sm:$0xff] }
  0xd1   : > { %2321 = vmatprep.subr.bf16.mxu0 %v3023_v59  ;;  %v746_v59 = vld [vmem:[#allocation11 + $0x328] sm:$0xff]  ;;  %v478_v34 = vld [vmem:[%s4237_s4] sm:$0x3] }
  0xd2   : > { %2252 = vmatpush1.bf16.msra.mxu1 %v3068_v6  ;;  %v3110_v60 = vcombine.low %v742_v57, %v746_v59  ;;  %v778_v27 = vld [vmem:[#allocation11 + $0x428] sm:$0xff] }
  0xd3   : > { %2253 = vmatprep.subr.bf16.mxu1 %v3077_v9  ;;  %v758_v9 = vld [vmem:[#allocation11 + $0x388] sm:$0xff] }
  0xd4   : > { %2322 = vmatpush1.bf16.msra.mxu0 %v3022_v61  ;;  %v3111_v61 = vcombine.high %v742_v57, %v746_v59  ;;  %v3126_v12 = vcombine.low %v758_v9, %v762_v11  ;;  %v782_v55 = vld [vmem:[#allocation11 + $0x448] sm:$0xff] }
  0xd5   : > { %2323 = vmatprep.subr.bf16.mxu0 %v3031_v63  ;;  %v749_v63 = vld [vmem:[#allocation11 + $0x340] sm:$0xff]  ;;  %v786_v56 = vld [vmem:[#allocation11 + $0x468] sm:$0xff] }
  0xd6   : > { %2254 = vmatpush1.bf16.msra.mxu1 %v3076_v14  ;;  %v3117_v2 = vcombine.high %v749_v63, %v753_v0  ;;  %v3116_v6 = vcombine.low %v749_v63, %v753_v0  ;;  %v789_v63 = vld [vmem:[#allocation11 + $0x480] sm:$0xff] }
  0xd7   : > { %2255 = vmatprep.subr.bf16.mxu1 %v3085_v16  ;;  %v769_v16 = vld [vmem:[#allocation11 + $0x3e0] sm:$0xff] }
  0xd8   : > { %2324 = vmatpush1.bf16.msra.mxu0 %v3030_v5  ;;  %v3119_v5 = vcombine.high %v750_v1, %v754_v3  ;;  %v793_v0 = vld [vmem:[#allocation11 + $0x4a0] sm:$0xff]  ;;  %v790_v1 = vld [vmem:[#allocation11 + $0x488] sm:$0xff] }
  0xd9   : > { %2325 = vmatprep.subr.bf16.mxu0 %v3039_v7  ;;  %v757_v7 = vld [vmem:[#allocation11 + $0x380] sm:$0xff] }
  0xda   : > { %2256 = vmatpush1.bf16.msra.mxu1 %v3084_v20  ;;  %v3125_v10 = vcombine.high %v757_v7, %v761_v8  ;;  %v3124_v14 = vcombine.low %v757_v7, %v761_v8  ;;  %v797_v8 = vld [vmem:[#allocation11 + $0x4c0] sm:$0xff] }
  0xdb   : > { %2257 = vmatprep.subr.bf16.mxu1 %v3093_v42 }
  0xdc   : > { %2326 = vmatpush1.bf16.msra.mxu0 %v3038_v13  ;;  %v3127_v13 = vcombine.high %v758_v9, %v762_v11  ;;  %v801_v9 = vld [vmem:[#allocation11 + $0x4e0] sm:$0xff]  ;;  %v802_v11 = vld [vmem:[#allocation11 + $0x4e8] sm:$0xff] }
  0xdd   : > { %2327 = vmatprep.subr.bf16.mxu0 %v3047_v15  ;;  %v765_v15 = vld [vmem:[#allocation11 + $0x3c0] sm:$0xff] }
  0xde   : > { %2258 = vmatpush1.bf16.msra.mxu1 %v3092_v46  ;;  %v3133_v18 = vcombine.high %v765_v15, %v769_v16  ;;  %v3132_v22 = vcombine.low %v765_v15, %v769_v16  ;;  %v805_v16 = vld [vmem:[#allocation11 + $0x500] sm:$0xff] }
  0xdf   : > { %2259 = vmatprep.subr.bf16.mxu1 %v3101_v50 }
  0xe0   : > { %2328 = vmatpush1.bf16.msra.mxu0 %v3046_v19  ;;  %v770_v19 = vld [vmem:[#allocation11 + $0x3e8] sm:$0xff] }
  0xe1   : > { %2329 = vmatprep.subr.bf16.mxu0 %v3055_v21  ;;  %v3134_v20 = vcombine.low %v766_v17, %v770_v19  ;;  %v3135_v21 = vcombine.high %v766_v17, %v770_v19  ;;  %v809_v17 = vld [vmem:[#allocation11 + $0x520] sm:$0xff]  ;;  %v810_v19 = vld [vmem:[#allocation11 + $0x528] sm:$0xff] }
  0xe2   : > { %2260 = vmatpush1.bf16.msra.mxu1 %v3100_v54  ;;  %v785_v54 = vld [vmem:[#allocation11 + $0x460] sm:$0xff] }
  0xe3   : > { %2261 = vmatprep.subr.bf16.mxu1 %v3109_v58  ;;  %v633_v58 = vld [vmem:[#allocation2 + $0x8] sm:$0xff] }
  0xe4   : > { %2330 = vmatpush1.bf16.msra.mxu0 %v3054_v24  ;;  %v777_v24 = vld [vmem:[#allocation11 + $0x420] sm:$0xff]  ;;  %v4103_v3 = vpack.c.bf16 %v633_v58, %v633_v58 }
  0xe5   : > { %2331 = vmatprep.subr.bf16.mxu0 %v3063_v25  ;;  %v774_v25 = vld [vmem:[#allocation11 + $0x408] sm:$0xff]  ;;  %v3141_v26 = vcombine.high %v773_v23, %v777_v24 }
  0xe6   : > { %2262 = vmatpush1.bf16.msra.mxu1 %v3108_v62  ;;  %v3143_v30 = vcombine.high %v774_v25, %v778_v27  ;;  %v3151_v62 = vcombine.high %v782_v55, %v786_v56 }
  0xe7   : > { %2263 = vmatprep.subr.bf16.mxu1 %v3117_v2  ;;  %v794_v2 = vld [vmem:[#allocation11 + $0x4a8] sm:$0xff] }
  0xe8   : > { %2332 = vmatpush1.bf16.msra.mxu0 %v3062_v28  ;;  %v3140_v28 = vcombine.low %v773_v23, %v777_v24  ;;  %v3159_v7 = vcombine.high %v790_v1, %v794_v2  ;;  %v813_v24 = vld [vmem:[#allocation11 + $0x540] sm:$0xff] }
  0xe9   : > { %2333 = vmatprep.subr.bf16.mxu0 %v3071_v29  ;;  %v3142_v29 = vcombine.low %v774_v25, %v778_v27  ;;  %v817_v25 = vld [vmem:[#allocation11 + $0x560] sm:$0xff]  ;;  %v818_v27 = vld [vmem:[#allocation11 + $0x568] sm:$0xff] }
  0xea   : > { %2264 = vmatpush1.bf16.msra.mxu1 %v3116_v6  ;;  %v3157_v6 = vcombine.high %v789_v63, %v793_v0 }
  0xeb   : > { %2265 = vmatprep.subr.bf16.mxu1 %v3125_v10  ;;  %v798_v10 = vld [vmem:[#allocation11 + $0x4c8] sm:$0xff] }
  0xec   : > { %2334 = vmatpush1.bf16.msra.mxu0 %v3070_v32  ;;  %v4086_v32 = vshrl.u32 %v480_v31, 7  ;;  %v3167_v15 = vcombine.high %v798_v10, %v802_v11 }
  0xed   : > { %2335 = vmatprep.subr.bf16.mxu0 %v3079_v33 }
  0xee   : > { %2266 = vmatpush1.bf16.msra.mxu1 %v3124_v14  ;;  %v482_v33 = vsub.s32 0, %v4086_v32  ;;  %v486_v35 = vsub.s32 1, %v4086_v32  ;;  %v3165_v14 = vcombine.high %v797_v8, %v801_v9 }
  0xef   : > { %2267 = vmatprep.subr.bf16.mxu1 %v3133_v18  ;;  %v806_v18 = vld [vmem:[#allocation11 + $0x508] sm:$0xff] }
  0xf0   : > { %2336 = vmatpush1.bf16.msra.mxu0 %v3078_v36  ;;  %v483_v36 = vrot.slane %v478_v34, %v482_v33  ;;  %v3175_v23 = vcombine.high %v806_v18, %v810_v19 }
  0xf1   : > { %2337 = vmatprep.subr.bf16.mxu0 %v3087_v37  ;;  %v487_v37 = vrot.slane %v478_v34, %v486_v35  ;;  %v821_v34 = vld [vmem:[#allocation11 + $0x580] sm:$0xff] }
  0xf2   : > { %2268 = vmatpush1.bf16.msra.mxu1 %v3132_v22  ;;  %v3173_v22 = vcombine.high %v805_v16, %v809_v17 }
  0xf3   : > { %2278 = vmatprep.subr.bf16.mxu1 %v3141_v26  ;;  %v814_v26 = vld [vmem:[#allocation11 + $0x548] sm:$0xff] }
  0xf4   : > { %2338 = vmatpush1.bf16.msra.mxu0 %v3086_v38  ;;  %v3183_v31 = vcombine.high %v814_v26, %v818_v27 }
  0xf5   : > { %2339 = vmatprep.subr.bf16.mxu0 %v3095_v45 }
  0xf8   : > { %2340 = vmatpush1.bf16.msra.mxu0 %v3094_v44 }
  0xf9   : > { %2341 = vmatprep.subr.bf16.mxu0 %v3103_v53 }
  0xfc   : > { %2342 = vmatpush1.bf16.msra.mxu0 %v3102_v52  ;;  %v781_v52 = vld [vmem:[#allocation11 + $0x440] sm:$0xff] }
  0xfd   : > { %2343 = vmatprep.subr.bf16.mxu0 %v3111_v61  ;;  %v3149_v61 = vcombine.high %v781_v52, %v785_v54 }
 0x100   : > { %2344 = vmatpush1.bf16.msra.mxu0 %v3110_v60 }
 0x101   : > { %2345 = vmatprep.subr.bf16.mxu0 %v3119_v5  ;;  %v3150_v5 = vcombine.low %v782_v55, %v786_v56 }
 0x104   : > { %2346 = vmatpush1.bf16.msra.mxu0 %v3118_v4  ;;  %v3148_v4 = vcombine.low %v781_v52, %v785_v54  ;;  %v841_v52 = vld [vmem:[#allocation11 + $0x620] sm:$0xff]  ;;  %v842_v54 = vld [vmem:[#allocation11 + $0x628] sm:$0xff] }
 0x105   : > { %2347 = vmatprep.subr.bf16.mxu0 %v3127_v13  ;;  %v3158_v13 = vcombine.low %v790_v1, %v794_v2 }
 0x108   : > { %2348 = vmatpush1.bf16.msra.mxu0 %v3126_v12  ;;  %v3156_v12 = vcombine.low %v789_v63, %v793_v0  ;;  %v846_v63 = vld [vmem:[#allocation11 + $0x648] sm:$0xff] }
 0x109   : > { %2349 = vmatprep.subr.bf16.mxu0 %v3135_v21  ;;  %v3166_v21 = vcombine.low %v798_v10, %v802_v11  ;;  %v850_v0 = vld [vmem:[#allocation11 + $0x668] sm:$0xff] }
 0x10a   : > { %v3214_v11 = vcombine.low %v846_v63, %v850_v0 }
 0x10c   : > { %2350 = vmatpush1.bf16.msra.mxu0 %v3134_v20  ;;  %v3164_v20 = vcombine.low %v797_v8, %v801_v9  ;;  %v854_v8 = vld [vmem:[#allocation11 + $0x688] sm:$0xff] }
 0x10d   : > { %2360 = vmatprep.subr.bf16.mxu0 %v3143_v30  ;;  %v3181_v30 = vcombine.high %v813_v24, %v817_v25  ;;  %v858_v9 = vld [vmem:[#allocation11 + $0x6a8] sm:$0xff] }
 0x1a2   : > { %v604_v38 = vpop.f32.mrb[0].mxu0 }
 0x1a3   : > { %v605_v39 = vadd.f32 %v604_v38, %v483_v36  ;;  %v606_v40 = vpop.f32.mrb[1].mxu0  ;;  %v825_v36 = vld [vmem:[#allocation11 + $0x5a0] sm:$0xff]  ;;  %v826_v38 = vld [vmem:[#allocation11 + $0x5a8] sm:$0xff] }
 0x1a4   : > { %v607_v41 = vadd.f32 %v606_v40, %v487_v37  ;;  %v608_v42 = vpop.f32.mrb[2].mxu0  ;;  %v822_v37 = vld [vmem:[#allocation11 + $0x588] sm:$0xff]  ;;  %v3182_v40 = vcombine.low %v814_v26, %v818_v27 }
 0x1a5   : > { %v613_v43 = vmin.f32 %v605_v39, 0.0  ;;  %v609_v44 = vpop.f32.mrb[3].mxu0  ;;  %vm611_vm0 = vcmp.gt.f32.partialorder %v605_v39, 0.0  ;;  %v3191_v42 = vcombine.high %v822_v37, %v826_v38 }
 0x1a6   : > { %v614_v45 = vmin.f32 %v607_v41, 0.0  ;;  %vm612_vm1 = vcmp.gt.f32.partialorder %v607_v41, 0.0  ;;  %v833_v44 = vld [vmem:[#allocation11 + $0x5e0] sm:$0xff] }
 0x1a7   : > { %v615_v46 = vmul.f32 1.442695, %v613_v43  ;;  %v829_v43 = vld [vmem:[#allocation11 + $0x5c0] sm:$0xff] }
 0x1a8   : > { %v617_v47 = vmul.f32 1.442695, %v614_v45  ;;  %v830_v45 = vld [vmem:[#allocation11 + $0x5c8] sm:$0xff]  ;;  %v3196_v55 = vcombine.low %v829_v43, %v833_v44 }
 0x1a9   : > { %3503 = vpow2.f32 %v615_v46  ;;  %v834_v46 = vld [vmem:[#allocation11 + $0x5e8] sm:$0xff] }
 0x1aa   : > { %3505 = vpow2.f32 %v617_v47  ;;  %v3188_v47 = vcombine.low %v821_v34, %v825_v36  ;;  %v3198_v56 = vcombine.low %v830_v45, %v834_v46 }
 0x1b3   : > { %v3504_v48 = vpop.eup %3503 }
 0x1b4   : > { %v3506_v49 = vpop.eup %3505  ;;  %v3004_v50 = vadd.f32 -1.0, %v3504_v48  ;;  %v3190_v48 = vcombine.low %v822_v37, %v826_v38 }
 0x1b5   : > { %v3005_v51 = vadd.f32 -1.0, %v3506_v49  ;;  %v3197_v49 = vcombine.high %v829_v43, %v833_v44  ;;  %v886_v43 = vld [vmem:[#allocation11 + $0x788] sm:$0xff] }
 0x1b6   : > { %v621_v53 = vsel %vm611_vm0, %v605_v39, %v3004_v50  ;;  %v3180_v39 = vcombine.low %v813_v24, %v817_v25  ;;  %v3199_v50 = vcombine.high %v830_v45, %v834_v46  ;;  %v870_v24 = vld [vmem:[#allocation11 + $0x708] sm:$0xff] }
 0x1b7   : > { %v622_v57 = vsel %vm612_vm1, %v607_v41, %v3005_v51  ;;  %v4099_v60 = vpack.c.bf16 %v621_v53, %v621_v53  ;;  %v3189_v41 = vcombine.high %v821_v34, %v825_v36  ;;  %v837_v51 = vld [vmem:[#allocation11 + $0x600] sm:$0xff]  ;;  %v838_v53 = vld [vmem:[#allocation11 + $0x608] sm:$0xff] }
 0x1b8   : > { %v4097_v59 = vpack.c.bf16 %v622_v57, %v622_v57  ;;  %v3205_v57 = vcombine.high %v837_v51, %v841_v52  ;;  %v3207_v58 = vcombine.high %v838_v53, %v842_v54  ;;  %v3204_v1 = vcombine.low %v837_v51, %v841_v52  ;;  %v874_v25 = vld [vmem:[#allocation11 + $0x728] sm:$0xff] }
 0x1b9   : > { %v3206_v2 = vcombine.low %v838_v53, %v842_v54  ;;  %v878_v34 = vld [vmem:[#allocation11 + $0x748] sm:$0xff]  ;;  %v3238_v38 = vcombine.low %v870_v24, %v874_v25 }
 0x1ba   : > { %2269 = vmatprep.mubr.bf16.mxu1 %v4097_v59  ;;  %2351 = vmatprep.mubr.bf16.mxu0 %v4097_v59  ;;  %v882_v36 = vld [vmem:[#allocation11 + $0x768] sm:$0xff] }
 0x1bb   : > { %2270 = vmatmul.mubr.bf16.vlgmr.msra.gmra.mrb[0].mxu1 %v4099_v60  ;;  %2352 = vmatmul.mubr.bf16.vlgmr.msra.gmra.mrb[4].mxu0 %v4099_v60  ;;  %v890_v44 = vld [vmem:[#allocation11 + $0x7a8] sm:$0xff]  ;;  %v3246_v46 = vcombine.low %v878_v34, %v882_v36 }
 0x1bc   : > { %2279 = vmatpush1.bf16.msra.mxu1 %v3140_v28  ;;  %2361 = vmatpush1.bf16.msra.mxu0 %v3142_v29  ;;  %v3172_v28 = vcombine.low %v805_v16, %v809_v17  ;;  %v3174_v29 = vcombine.low %v806_v18, %v810_v19  ;;  %v862_v16 = vld [vmem:[#allocation11 + $0x6c8] sm:$0xff]  ;;  %v3222_v19 = vcombine.low %v854_v8, %v858_v9 }
 0x1bd   : > { %2280 = vmatprep.subr.bf16.mxu1 %v3149_v61  ;;  %2362 = vmatprep.subr.bf16.mxu0 %v3151_v62  ;;  %v845_v61 = vld [vmem:[#allocation11 + $0x640] sm:$0xff]  ;;  %v866_v17 = vld [vmem:[#allocation11 + $0x6e8] sm:$0xff]  ;;  %v3254_v54 = vcombine.low %v886_v43, %v890_v44 }
 0x1be   : > { %2310 = vmatprep.mubr.bf16.mxu1 %v4103_v3  ;;  %2392 = vmatprep.mubr.bf16.mxu0 %v4103_v3  ;;  %v849_v62 = vld [vmem:[#allocation11 + $0x660] sm:$0xff]  ;;  %v3230_v27 = vcombine.low %v862_v16, %v866_v17  ;;  %v894_v51 = vld [vmem:[#allocation11 + $0x7c8] sm:$0xff] }
 0x1bf   : > { %v3212_v10 = vcombine.low %v845_v61, %v849_v62  ;;  %v898_v52 = vld [vmem:[#allocation11 + $0x7e8] sm:$0xff] }
 0x1c0   : > { %2281 = vmatpush1.bf16.msra.mxu1 %v3148_v4  ;;  %2363 = vmatpush1.bf16.msra.mxu0 %v3150_v5  ;;  %v3213_v4 = vcombine.high %v845_v61, %v849_v62  ;;  %v3215_v5 = vcombine.high %v846_v63, %v850_v0  ;;  %v648_v61 = vld [vmem:[#allocation11 + $0x18] sm:$0xff]  ;;  %v3262_v0 = vcombine.low %v894_v51, %v898_v52 }
 0x1c1   : > { %2282 = vmatprep.subr.bf16.mxu1 %v3157_v6  ;;  %2364 = vmatprep.subr.bf16.mxu0 %v3159_v7  ;;  %v853_v6 = vld [vmem:[#allocation11 + $0x680] sm:$0xff]  ;;  %v652_v62 = vld [vmem:[#allocation11 + $0x38] sm:$0xff] }
 0x1c2   : > { %v857_v7 = vld [vmem:[#allocation11 + $0x6a0] sm:$0xff] }
 0x1c3   : > { %v3220_v18 = vcombine.low %v853_v6, %v857_v7 }
 0x1c4   : > { %2283 = vmatpush1.bf16.msra.mxu1 %v3156_v12  ;;  %2365 = vmatpush1.bf16.msra.mxu0 %v3158_v13  ;;  %v3221_v12 = vcombine.high %v853_v6, %v857_v7  ;;  %v3223_v13 = vcombine.high %v854_v8, %v858_v9  ;;  %v659_v7 = vld [vmem:[#allocation11 + $0x70] sm:$0xff]  ;;  %v656_v8 = vld [vmem:[#allocation11 + $0x58] sm:$0xff] }
 0x1c5   : > { %2284 = vmatprep.subr.bf16.mxu1 %v3165_v14  ;;  %2366 = vmatprep.subr.bf16.mxu0 %v3167_v15  ;;  %v861_v14 = vld [vmem:[#allocation11 + $0x6c0] sm:$0xff]  ;;  %v660_v9 = vld [vmem:[#allocation11 + $0x78] sm:$0xff] }
 0x1c6   : > { %v865_v15 = vld [vmem:[#allocation11 + $0x6e0] sm:$0xff] }
 0x1c7   : > { %v3228_v26 = vcombine.low %v861_v14, %v865_v15 }
 0x1c8   : > { %2285 = vmatpush1.bf16.msra.mxu1 %v3164_v20  ;;  %2367 = vmatpush1.bf16.msra.mxu0 %v3166_v21  ;;  %v3229_v20 = vcombine.high %v861_v14, %v865_v15  ;;  %v3231_v21 = vcombine.high %v862_v16, %v866_v17  ;;  %v663_v14 = vld [vmem:[#allocation11 + $0x90] sm:$0xff]  ;;  %v664_v16 = vld [vmem:[#allocation11 + $0x98] sm:$0xff] }
 0x1c9   : > { %2286 = vmatprep.subr.bf16.mxu1 %v3173_v22  ;;  %2368 = vmatprep.subr.bf16.mxu0 %v3175_v23  ;;  %v869_v22 = vld [vmem:[#allocation11 + $0x700] sm:$0xff]  ;;  %v667_v15 = vld [vmem:[#allocation11 + $0xb0] sm:$0xff]  ;;  %v668_v17 = vld [vmem:[#allocation11 + $0xb8] sm:$0xff] }
 0x1ca   : > { %v873_v23 = vld [vmem:[#allocation11 + $0x720] sm:$0xff] }
 0x1cb   : > { %v3236_v37 = vcombine.low %v869_v22, %v873_v23 }
 0x1cc   : > { %2287 = vmatpush1.bf16.msra.mxu1 %v3172_v28  ;;  %2369 = vmatpush1.bf16.msra.mxu0 %v3174_v29  ;;  %v3237_v28 = vcombine.high %v869_v22, %v873_v23  ;;  %v3239_v29 = vcombine.high %v870_v24, %v874_v25  ;;  %v671_v22 = vld [vmem:[#allocation11 + $0xd0] sm:$0xff]  ;;  %v672_v24 = vld [vmem:[#allocation11 + $0xd8] sm:$0xff] }
 0x1cd   : > { %2288 = vmatprep.subr.bf16.mxu1 %v3181_v30  ;;  %2370 = vmatprep.subr.bf16.mxu0 %v3183_v31  ;;  %v877_v30 = vld [vmem:[#allocation11 + $0x740] sm:$0xff]  ;;  %v675_v23 = vld [vmem:[#allocation11 + $0xf0] sm:$0xff]  ;;  %v676_v25 = vld [vmem:[#allocation11 + $0xf8] sm:$0xff] }
 0x1ce   : > { %v881_v31 = vld [vmem:[#allocation11 + $0x760] sm:$0xff] }
 0x1cf   : > { %v3244_v45 = vcombine.low %v877_v30, %v881_v31 }
 0x1d0   : > { %2289 = vmatpush1.bf16.msra.mxu1 %v3180_v39  ;;  %2371 = vmatpush1.bf16.msra.mxu0 %v3182_v40  ;;  %v3245_v39 = vcombine.high %v877_v30, %v881_v31  ;;  %v3247_v40 = vcombine.high %v878_v34, %v882_v36  ;;  %v679_v30 = vld [vmem:[#allocation11 + $0x110] sm:$0xff]  ;;  %v684_v34 = vld [vmem:[#allocation11 + $0x138] sm:$0xff]  ;;  %v3040_v36 = vcombine.low %v671_v22, %v675_v23 }
 0x1d1   : > { %2290 = vmatprep.subr.bf16.mxu1 %v3189_v41  ;;  %2372 = vmatprep.subr.bf16.mxu0 %v3191_v42  ;;  %v885_v41 = vld [vmem:[#allocation11 + $0x780] sm:$0xff]  ;;  %v683_v31 = vld [vmem:[#allocation11 + $0x130] sm:$0xff] }
 0x1d2   : > { %v889_v42 = vld [vmem:[#allocation11 + $0x7a0] sm:$0xff] }
 0x1d3   : > { %v3252_v53 = vcombine.low %v885_v41, %v889_v42 }
 0x1d4   : > { %2291 = vmatpush1.bf16.msra.mxu1 %v3188_v47  ;;  %2373 = vmatpush1.bf16.msra.mxu0 %v3190_v48  ;;  %v3253_v47 = vcombine.high %v885_v41, %v889_v42  ;;  %v3255_v48 = vcombine.high %v886_v43, %v890_v44  ;;  %v691_v41 = vld [vmem:[#allocation11 + $0x170] sm:$0xff]  ;;  %v688_v42 = vld [vmem:[#allocation11 + $0x158] sm:$0xff]  ;;  %v3048_v44 = vcombine.low %v679_v30, %v683_v31 }
 0x1d5   : > { %2292 = vmatprep.subr.bf16.mxu1 %v3197_v49  ;;  %2374 = vmatprep.subr.bf16.mxu0 %v3199_v50  ;;  %v893_v49 = vld [vmem:[#allocation11 + $0x7c0] sm:$0xff]  ;;  %v692_v43 = vld [vmem:[#allocation11 + $0x178] sm:$0xff] }
 0x1d6   : > { %v897_v50 = vld [vmem:[#allocation11 + $0x7e0] sm:$0xff] }
 0x1d7   : > { %v3260_v63 = vcombine.low %v893_v49, %v897_v50 }
 0x1d8   : > { %2293 = vmatpush1.bf16.msra.mxu1 %v3196_v55  ;;  %2375 = vmatpush1.bf16.msra.mxu0 %v3198_v56  ;;  %v3261_v55 = vcombine.high %v893_v49, %v897_v50  ;;  %v3263_v56 = vcombine.high %v894_v51, %v898_v52  ;;  %v699_v49 = vld [vmem:[#allocation11 + $0x1b0] sm:$0xff]  ;;  %v696_v50 = vld [vmem:[#allocation11 + $0x198] sm:$0xff] }
 0x1d9   : > { %2294 = vmatprep.subr.bf16.mxu1 %v3205_v57  ;;  %2376 = vmatprep.subr.bf16.mxu0 %v3207_v58  ;;  %v647_v57 = vld [vmem:[#allocation11 + $0x10] sm:$0xff]  ;;  %v700_v51 = vld [vmem:[#allocation11 + $0x1b8] sm:$0xff] }
 0x1da   : > { %v651_v58 = vld [vmem:[#allocation11 + $0x30] sm:$0xff] }
 0x1dc   : > { %2295 = vmatpush1.bf16.msra.mxu1 %v3204_v1  ;;  %2377 = vmatpush1.bf16.msra.mxu0 %v3206_v2  ;;  %v632_v1 = vld [vmem:[#allocation2] sm:$0xff]  ;;  %v3017_v2 = vcombine.high %v647_v57, %v651_v58 }
 0x1dd   : > { %2296 = vmatprep.subr.bf16.mxu1 %v3213_v4  ;;  %2378 = vmatprep.subr.bf16.mxu0 %v3215_v5  ;;  %v3019_v4 = vcombine.high %v648_v61, %v652_v62  ;;  %v655_v5 = vld [vmem:[#allocation11 + $0x50] sm:$0xff]  ;;  %v4109_v6 = vpack.c.bf16 %v632_v1, %v632_v1 }
 0x1e0   : > { %2297 = vmatpush1.bf16.msra.mxu1 %v3212_v10  ;;  %2379 = vmatpush1.bf16.msra.mxu0 %v3214_v11  ;;  %v3016_v10 = vcombine.low %v647_v57, %v651_v58  ;;  %v3018_v11 = vcombine.low %v648_v61, %v652_v62  ;;  %v707_v57 = vld [vmem:[#allocation11 + $0x1f0] sm:$0xff]  ;;  %v704_v58 = vld [vmem:[#allocation11 + $0x1d8] sm:$0xff] }
 0x1e1   : > { %2298 = vmatprep.subr.bf16.mxu1 %v3221_v12  ;;  %2380 = vmatprep.subr.bf16.mxu0 %v3223_v13  ;;  %v3025_v12 = vcombine.high %v655_v5, %v659_v7  ;;  %v3027_v13 = vcombine.high %v656_v8, %v660_v9  ;;  %v708_v61 = vld [vmem:[#allocation11 + $0x1f8] sm:$0xff] }
 0x1e2   : > { %v3075_v1 = vcombine.high %v704_v58, %v708_v61 }
 0x1e4   : > { %2299 = vmatpush1.bf16.msra.mxu1 %v3220_v18  ;;  %2381 = vmatpush1.bf16.msra.mxu0 %v3222_v19  ;;  %v3024_v18 = vcombine.low %v655_v5, %v659_v7  ;;  %v3026_v19 = vcombine.low %v656_v8, %v660_v9  ;;  %v712_v5 = vld [vmem:[#allocation11 + $0x218] sm:$0xff]  ;;  %v3074_v9 = vcombine.low %v704_v58, %v708_v61 }
 0x1e5   : > { %2300 = vmatprep.subr.bf16.mxu1 %v3229_v20  ;;  %2382 = vmatprep.subr.bf16.mxu0 %v3231_v21  ;;  %v3033_v20 = vcombine.high %v663_v14, %v667_v15  ;;  %v3035_v21 = vcombine.high %v664_v16, %v668_v17  ;;  %v716_v7 = vld [vmem:[#allocation11 + $0x238] sm:$0xff] }
 0x1e8   : > { %2301 = vmatpush1.bf16.msra.mxu1 %v3228_v26  ;;  %2383 = vmatpush1.bf16.msra.mxu0 %v3230_v27  ;;  %v3032_v26 = vcombine.low %v663_v14, %v667_v15  ;;  %v3034_v27 = vcombine.low %v664_v16, %v668_v17  ;;  %v720_v14 = vld [vmem:[#allocation11 + $0x258] sm:$0xff]  ;;  %v3082_v17 = vcombine.low %v712_v5, %v716_v7 }
 0x1e9   : > { %2302 = vmatprep.subr.bf16.mxu1 %v3237_v28  ;;  %2384 = vmatprep.subr.bf16.mxu0 %v3239_v29  ;;  %v3041_v28 = vcombine.high %v671_v22, %v675_v23  ;;  %v3043_v29 = vcombine.high %v672_v24, %v676_v25  ;;  %v724_v15 = vld [vmem:[#allocation11 + $0x278] sm:$0xff] }
 0x1ea   : > { %v728_v22 = vld [vmem:[#allocation11 + $0x298] sm:$0xff] }
 0x1eb   : > { %v732_v23 = vld [vmem:[#allocation11 + $0x2b8] sm:$0xff] }
 0x1ec   : > { %2303 = vmatpush1.bf16.msra.mxu1 %v3236_v37  ;;  %2385 = vmatpush1.bf16.msra.mxu0 %v3238_v38  ;;  %v3042_v37 = vcombine.low %v672_v24, %v676_v25  ;;  %v3049_v38 = vcombine.high %v679_v30, %v683_v31  ;;  %v3090_v25 = vcombine.low %v720_v14, %v724_v15  ;;  %v736_v30 = vld [vmem:[#allocation11 + $0x2d8] sm:$0xff] }
 0x1ed   : > { %2304 = vmatprep.subr.bf16.mxu1 %v3245_v39  ;;  %2386 = vmatprep.subr.bf16.mxu0 %v3247_v40  ;;  %v687_v40 = vld [vmem:[#allocation11 + $0x150] sm:$0xff]  ;;  %v740_v31 = vld [vmem:[#allocation11 + $0x2f8] sm:$0xff] }
 0x1ee   : > { %v3056_v52 = vcombine.low %v687_v40, %v691_v41 }
 0x1f0   : > { %2305 = vmatpush1.bf16.msra.mxu1 %v3244_v45  ;;  %2387 = vmatpush1.bf16.msra.mxu0 %v3246_v46  ;;  %v3057_v46 = vcombine.high %v687_v40, %v691_v41  ;;  %v744_v40 = vld [vmem:[#allocation11 + $0x318] sm:$0xff] }
 0x1f1   : > { %2306 = vmatprep.subr.bf16.mxu1 %v3253_v47  ;;  %2388 = vmatprep.subr.bf16.mxu0 %v3255_v48  ;;  %v3059_v47 = vcombine.high %v688_v42, %v692_v43  ;;  %v695_v48 = vld [vmem:[#allocation11 + $0x190] sm:$0xff]  ;;  %v748_v41 = vld [vmem:[#allocation11 + $0x338] sm:$0xff] }
 0x1f2   : > { %v3064_v62 = vcombine.low %v695_v48, %v699_v49 }
 0x1f4   : > { %2307 = vmatpush1.bf16.msra.mxu1 %v3252_v53  ;;  %2389 = vmatpush1.bf16.msra.mxu0 %v3254_v54  ;;  %v3058_v53 = vcombine.low %v688_v42, %v692_v43  ;;  %v3065_v54 = vcombine.high %v695_v48, %v699_v49  ;;  %v3106_v43 = vcombine.low %v736_v30, %v740_v31  ;;  %v752_v48 = vld [vmem:[#allocation11 + $0x358] sm:$0xff] }
 0x1f5   : > { %2308 = vmatprep.subr.bf16.mxu1 %v3261_v55  ;;  %2390 = vmatprep.subr.bf16.mxu0 %v3263_v56  ;;  %v3067_v55 = vcombine.high %v696_v50, %v700_v51  ;;  %v703_v56 = vld [vmem:[#allocation11 + $0x1d0] sm:$0xff]  ;;  %v756_v49 = vld [vmem:[#allocation11 + $0x378] sm:$0xff] }
 0x1f6   : > { %v3072_v8 = vcombine.low %v703_v56, %v707_v57  ;;  %v3122_v61 = vcombine.low %v752_v48, %v756_v49 }
 0x1f8   : > { %2309 = vmatpush1.bf16.msra.mxu1 %v3260_v63  ;;  %2391 = vmatpush1.bf16.msra.mxu0 %v3262_v0  ;;  %v3066_v63 = vcombine.low %v696_v50, %v700_v51  ;;  %v3073_v0 = vcombine.high %v703_v56, %v707_v57  ;;  %v3114_v51 = vcombine.low %v744_v40, %v748_v41  ;;  %v760_v56 = vld [vmem:[#allocation11 + $0x398] sm:$0xff] }
 0x1f9   : > { %2401 = vmatprep.subr.bf16.mxu1 %v3017_v2  ;;  %2483 = vmatprep.subr.bf16.mxu0 %v3019_v4  ;;  %v711_v2 = vld [vmem:[#allocation11 + $0x210] sm:$0xff]  ;;  %v764_v57 = vld [vmem:[#allocation11 + $0x3b8] sm:$0xff] }
 0x1fa   : > { %v715_v4 = vld [vmem:[#allocation11 + $0x230] sm:$0xff] }
 0x1fb   : > { %2311 = vmatmul.mubr.bf16.vlgmr.msra.gmra.mrb[0].mxu1 %v4109_v6  ;;  %2393 = vmatmul.mubr.bf16.vlgmr.msra.gmra.mrb[4].mxu0 %v4109_v6  ;;  %v3080_v16 = vcombine.low %v711_v2, %v715_v4 }
 0x1fc   : > { %2402 = vmatpush1.bf16.msra.mxu1 %v3016_v10  ;;  %2433 = vmatprep.mubr.bf16.mxu1 %v4097_v59  ;;  %v3081_v10 = vcombine.high %v711_v2, %v715_v4  ;;  %v768_v2 = vld [vmem:[#allocation11 + $0x3d8] sm:$0xff] }
 0x1fd   : > { %2484 = vmatpush1.bf16.msra.mxu0 %v3018_v11  ;;  %2515 = vmatprep.mubr.bf16.mxu0 %v4097_v59  ;;  %v680_v59 = vld [vmem:[#allocation11 + $0x118] sm:$0xff]  ;;  %v3083_v11 = vcombine.high %v712_v5, %v716_v7  ;;  %v3130_v7 = vcombine.low %v760_v56, %v764_v57 }
 0x1fe   : > { %2403 = vmatprep.subr.bf16.mxu1 %v3025_v12  ;;  %2485 = vmatprep.subr.bf16.mxu0 %v3027_v13  ;;  %v3051_v39 = vcombine.high %v680_v59, %v684_v34  ;;  %v3050_v45 = vcombine.low %v680_v59, %v684_v34  ;;  %v719_v12 = vld [vmem:[#allocation11 + $0x250] sm:$0xff]  ;;  %v3098_v34 = vcombine.low %v728_v22, %v732_v23  ;;  %v772_v4 = vld [vmem:[#allocation11 + $0x3f8] sm:$0xff] }
 0x1ff   : > { %v723_v13 = vld [vmem:[#allocation11 + $0x270] sm:$0xff] }
 0x200   : > { %2404 = vmatpush1.bf16.msra.mxu1 %v3024_v18  ;;  %v3089_v18 = vcombine.high %v719_v12, %v723_v13  ;;  %v3088_v24 = vcombine.low %v719_v12, %v723_v13  ;;  %v776_v12 = vld [vmem:[#allocation11 + $0x418] sm:$0xff] }
 0x201   : > { %2486 = vmatpush1.bf16.msra.mxu0 %v3026_v19  ;;  %2405 = vmatprep.subr.bf16.mxu1 %v3033_v20  ;;  %v3091_v19 = vcombine.high %v720_v14, %v724_v15  ;;  %v727_v20 = vld [vmem:[#allocation11 + $0x290] sm:$0xff]  ;;  %v780_v13 = vld [vmem:[#allocation11 + $0x438] sm:$0xff]  ;;  %v3138_v15 = vcombine.low %v768_v2, %v772_v4 }
 0x202   : > { %2487 = vmatprep.subr.bf16.mxu0 %v3035_v21  ;;  %v731_v21 = vld [vmem:[#allocation11 + $0x2b0] sm:$0xff] }
 0x203   : > { %v3096_v59 = vcombine.low %v727_v20, %v731_v21 }
 0x204   : > { %2406 = vmatpush1.bf16.msra.mxu1 %v3032_v26  ;;  %v3097_v26 = vcombine.high %v727_v20, %v731_v21  ;;  %v784_v20 = vld [vmem:[#allocation11 + $0x458] sm:$0xff] }
 0x205   : > { %2488 = vmatpush1.bf16.msra.mxu0 %v3034_v27  ;;  %2407 = vmatprep.subr.bf16.mxu1 %v3041_v28  ;;  %v3099_v27 = vcombine.high %v728_v22, %v732_v23  ;;  %v735_v28 = vld [vmem:[#allocation11 + $0x2d0] sm:$0xff]  ;;  %v788_v21 = vld [vmem:[#allocation11 + $0x478] sm:$0xff]  ;;  %v3146_v23 = vcombine.low %v776_v12, %v780_v13 }
 0x206   : > { %2489 = vmatprep.subr.bf16.mxu0 %v3043_v29  ;;  %v739_v29 = vld [vmem:[#allocation11 + $0x2f0] sm:$0xff] }
 0x207   : > { %v3104_v42 = vcombine.low %v735_v28, %v739_v29 }
 0x208   : > { %2408 = vmatpush1.bf16.msra.mxu1 %v3040_v36  ;;  %v3105_v36 = vcombine.high %v735_v28, %v739_v29  ;;  %v792_v28 = vld [vmem:[#allocation11 + $0x498] sm:$0xff] }
 0x209   : > { %2490 = vmatpush1.bf16.msra.mxu0 %v3042_v37  ;;  %2409 = vmatprep.subr.bf16.mxu1 %v3049_v38  ;;  %v3107_v37 = vcombine.high %v736_v30, %v740_v31  ;;  %v743_v38 = vld [vmem:[#allocation11 + $0x310] sm:$0xff]  ;;  %v796_v29 = vld [vmem:[#allocation11 + $0x4b8] sm:$0xff]  ;;  %v3154_v31 = vcombine.low %v784_v20, %v788_v21 }
 0x20a   : > { %2491 = vmatprep.subr.bf16.mxu0 %v3051_v39  ;;  %v747_v39 = vld [vmem:[#allocation11 + $0x330] sm:$0xff] }
 0x20b   : > { %v3112_v50 = vcombine.low %v743_v38, %v747_v39 }
 0x20c   : > { %2410 = vmatpush1.bf16.msra.mxu1 %v3048_v44  ;;  %v3113_v44 = vcombine.high %v743_v38, %v747_v39  ;;  %v800_v38 = vld [vmem:[#allocation11 + $0x4d8] sm:$0xff] }
 0x20d   : > { %2492 = vmatpush1.bf16.msra.mxu0 %v3050_v45  ;;  %2411 = vmatprep.subr.bf16.mxu1 %v3057_v46  ;;  %v3115_v45 = vcombine.high %v744_v40, %v748_v41  ;;  %v751_v46 = vld [vmem:[#allocation11 + $0x350] sm:$0xff]  ;;  %v804_v39 = vld [vmem:[#allocation11 + $0x4f8] sm:$0xff] }
 0x20e   : > { %2493 = vmatprep.subr.bf16.mxu0 %v3059_v47  ;;  %v755_v47 = vld [vmem:[#allocation11 + $0x370] sm:$0xff] }
 0x20f   : > { %v3120_v58 = vcombine.low %v751_v46, %v755_v47 }
 0x210   : > { %2412 = vmatpush1.bf16.msra.mxu1 %v3056_v52  ;;  %v3121_v52 = vcombine.high %v751_v46, %v755_v47  ;;  %v812_v46 = vld [vmem:[#allocation11 + $0x538] sm:$0xff] }
 0x211   : > { %2494 = vmatpush1.bf16.msra.mxu0 %v3058_v53  ;;  %2413 = vmatprep.subr.bf16.mxu1 %v3065_v54  ;;  %v3123_v53 = vcombine.high %v752_v48, %v756_v49  ;;  %v759_v54 = vld [vmem:[#allocation11 + $0x390] sm:$0xff]  ;;  %v3170_v48 = vcombine.low %v800_v38, %v804_v39 }
 0x212   : > { %2495 = vmatprep.subr.bf16.mxu0 %v3067_v55  ;;  %v763_v55 = vld [vmem:[#allocation11 + $0x3b0] sm:$0xff] }
 0x213   : > { %v3128_v5 = vcombine.low %v759_v54, %v763_v55 }
 0x214   : > { %2414 = vmatpush1.bf16.msra.mxu1 %v3064_v62  ;;  %v3129_v62 = vcombine.high %v759_v54, %v763_v55 }
 0x215   : > { %2496 = vmatpush1.bf16.msra.mxu0 %v3066_v63  ;;  %2415 = vmatprep.subr.bf16.mxu1 %v3073_v0  ;;  %v3131_v63 = vcombine.high %v760_v56, %v764_v57  ;;  %v767_v0 = vld [vmem:[#allocation11 + $0x3d0] sm:$0xff] }
 0x216   : > { %2497 = vmatprep.subr.bf16.mxu0 %v3075_v1  ;;  %v771_v1 = vld [vmem:[#allocation11 + $0x3f0] sm:$0xff] }
 0x217   : > { %v3136_v14 = vcombine.low %v767_v0, %v771_v1 }
 0x218   : > { %2416 = vmatpush1.bf16.msra.mxu1 %v3072_v8  ;;  %v3137_v8 = vcombine.high %v767_v0, %v771_v1 }
 0x219   : > { %2498 = vmatpush1.bf16.msra.mxu0 %v3074_v9  ;;  %2417 = vmatprep.subr.bf16.mxu1 %v3081_v10  ;;  %v3139_v9 = vcombine.high %v768_v2, %v772_v4  ;;  %v775_v10 = vld [vmem:[#allocation11 + $0x410] sm:$0xff] }
 0x21a   : > { %2499 = vmatprep.subr.bf16.mxu0 %v3083_v11  ;;  %v779_v11 = vld [vmem:[#allocation11 + $0x430] sm:$0xff] }
 0x21b   : > { %v3144_v22 = vcombine.low %v775_v10, %v779_v11 }
 0x21c   : > { %2418 = vmatpush1.bf16.msra.mxu1 %v3080_v16  ;;  %v3145_v16 = vcombine.high %v775_v10, %v779_v11 }
 0x21d   : > { %2500 = vmatpush1.bf16.msra.mxu0 %v3082_v17  ;;  %2419 = vmatprep.subr.bf16.mxu1 %v3089_v18  ;;  %v3147_v17 = vcombine.high %v776_v12, %v780_v13  ;;  %v783_v18 = vld [vmem:[#allocation11 + $0x450] sm:$0xff] }
 0x21e   : > { %2501 = vmatprep.subr.bf16.mxu0 %v3091_v19  ;;  %v787_v19 = vld [vmem:[#allocation11 + $0x470] sm:$0xff] }
 0x21f   : > { %v3152_v30 = vcombine.low %v783_v18, %v787_v19 }
 0x220   : > { %2420 = vmatpush1.bf16.msra.mxu1 %v3088_v24  ;;  %v3153_v24 = vcombine.high %v783_v18, %v787_v19 }
 0x221   : > { %2502 = vmatpush1.bf16.msra.mxu0 %v3090_v25  ;;  %2421 = vmatprep.subr.bf16.mxu1 %v3097_v26  ;;  %v3155_v25 = vcombine.high %v784_v20, %v788_v21  ;;  %v791_v26 = vld [vmem:[#allocation11 + $0x490] sm:$0xff] }
 0x222   : > { %2503 = vmatprep.subr.bf16.mxu0 %v3099_v27  ;;  %v795_v27 = vld [vmem:[#allocation11 + $0x4b0] sm:$0xff] }
 0x223   : > { %v3160_v40 = vcombine.low %v791_v26, %v795_v27 }
 0x224   : > { %2422 = vmatpush1.bf16.msra.mxu1 %v3096_v59  ;;  %v3161_v59 = vcombine.high %v791_v26, %v795_v27 }
 0x225   : > { %2504 = vmatpush1.bf16.msra.mxu0 %v3098_v34  ;;  %2423 = vmatprep.subr.bf16.mxu1 %v3105_v36  ;;  %v3163_v34 = vcombine.high %v792_v28, %v796_v29  ;;  %v799_v36 = vld [vmem:[#allocation11 + $0x4d0] sm:$0xff] }
 0x226   : > { %2505 = vmatprep.subr.bf16.mxu0 %v3107_v37  ;;  %v803_v37 = vld [vmem:[#allocation11 + $0x4f0] sm:$0xff] }
 0x227   : > { %v3169_v41 = vcombine.high %v799_v36, %v803_v37  ;;  %v3168_v47 = vcombine.low %v799_v36, %v803_v37 }
 0x228   : > { %2424 = vmatpush1.bf16.msra.mxu1 %v3104_v42  ;;  %v3171_v42 = vcombine.high %v800_v38, %v804_v39 }
 0x229   : > { %2506 = vmatpush1.bf16.msra.mxu0 %v3106_v43  ;;  %2425 = vmatprep.subr.bf16.mxu1 %v3113_v44  ;;  %v807_v43 = vld [vmem:[#allocation11 + $0x510] sm:$0xff] }
 0x22a   : > { %2507 = vmatprep.subr.bf16.mxu0 %v3115_v45  ;;  %v811_v44 = vld [vmem:[#allocation11 + $0x530] sm:$0xff]  ;;  %v808_v45 = vld [vmem:[#allocation11 + $0x518] sm:$0xff] }
 0x22b   : > { %v3177_v49 = vcombine.high %v807_v43, %v811_v44  ;;  %v3176_v54 = vcombine.low %v807_v43, %v811_v44  ;;  %v3178_v55 = vcombine.low %v808_v45, %v812_v46 }
 0x22c   : > { %2426 = vmatpush1.bf16.msra.mxu1 %v3112_v50  ;;  %v815_v50 = vld [vmem:[#allocation11 + $0x550] sm:$0xff] }
 0x22d   : > { %2508 = vmatpush1.bf16.msra.mxu0 %v3114_v51  ;;  %2427 = vmatprep.subr.bf16.mxu1 %v3121_v52  ;;  %v819_v51 = vld [vmem:[#allocation11 + $0x570] sm:$0xff]  ;;  %v816_v52 = vld [vmem:[#allocation11 + $0x558] sm:$0xff] }
 0x22e   : > { %2509 = vmatprep.subr.bf16.mxu0 %v3123_v53  ;;  %v820_v53 = vld [vmem:[#allocation11 + $0x578] sm:$0xff]  ;;  %v3185_v56 = vcombine.high %v815_v50, %v819_v51  ;;  %v3184_v0 = vcombine.low %v815_v50, %v819_v51 }
 0x22f   : > { %v3187_v57 = vcombine.high %v816_v52, %v820_v53  ;;  %v3186_v1 = vcombine.low %v816_v52, %v820_v53 }
 0x230   : > { %2428 = vmatpush1.bf16.msra.mxu1 %v3120_v58  ;;  %v823_v58 = vld [vmem:[#allocation11 + $0x590] sm:$0xff] }
 0x231   : > { %2510 = vmatpush1.bf16.msra.mxu0 %v3122_v61  ;;  %2429 = vmatprep.subr.bf16.mxu1 %v3129_v62  ;;  %v827_v61 = vld [vmem:[#allocation11 + $0x5b0] sm:$0xff]  ;;  %v824_v62 = vld [vmem:[#allocation11 + $0x598] sm:$0xff] }
 0x232   : > { %2511 = vmatprep.subr.bf16.mxu0 %v3131_v63  ;;  %v828_v63 = vld [vmem:[#allocation11 + $0x5b8] sm:$0xff]  ;;  %v3193_v2 = vcombine.high %v823_v58, %v827_v61  ;;  %v3192_v10 = vcombine.low %v823_v58, %v827_v61 }
 0x233   : > { %v3195_v4 = vcombine.high %v824_v62, %v828_v63  ;;  %v3194_v11 = vcombine.low %v824_v62, %v828_v63 }
 0x234   : > { %2430 = vmatpush1.bf16.msra.mxu1 %v3128_v5  ;;  %v831_v5 = vld [vmem:[#allocation11 + $0x5d0] sm:$0xff] }
 0x235   : > { %2512 = vmatpush1.bf16.msra.mxu0 %v3130_v7  ;;  %2431 = vmatprep.subr.bf16.mxu1 %v3137_v8  ;;  %v835_v7 = vld [vmem:[#allocation11 + $0x5f0] sm:$0xff]  ;;  %v832_v8 = vld [vmem:[#allocation11 + $0x5d8] sm:$0xff] }
 0x236   : > { %2513 = vmatprep.subr.bf16.mxu0 %v3139_v9  ;;  %v836_v9 = vld [vmem:[#allocation11 + $0x5f8] sm:$0xff]  ;;  %v3201_v12 = vcombine.high %v831_v5, %v835_v7  ;;  %v3200_v18 = vcombine.low %v831_v5, %v835_v7 }
 0x237   : > { %v3203_v13 = vcombine.high %v832_v8, %v836_v9  ;;  %v3202_v19 = vcombine.low %v832_v8, %v836_v9 }
 0x238   : > { %2432 = vmatpush1.bf16.msra.mxu1 %v3136_v14  ;;  %v839_v14 = vld [vmem:[#allocation11 + $0x610] sm:$0xff] }
 0x239   : > { %2514 = vmatpush1.bf16.msra.mxu0 %v3138_v15  ;;  %2442 = vmatprep.subr.bf16.mxu1 %v3145_v16  ;;  %v843_v15 = vld [vmem:[#allocation11 + $0x630] sm:$0xff]  ;;  %v840_v16 = vld [vmem:[#allocation11 + $0x618] sm:$0xff] }
 0x23a   : > { %2524 = vmatprep.subr.bf16.mxu0 %v3147_v17  ;;  %v844_v17 = vld [vmem:[#allocation11 + $0x638] sm:$0xff]  ;;  %v3209_v20 = vcombine.high %v839_v14, %v843_v15  ;;  %v3208_v26 = vcombine.low %v839_v14, %v843_v15 }
 0x23b   : > { %2434 = vmatmul.mubr.bf16.vlgmr.msra.gmra.mrb[4].mxu1 %v4099_v60  ;;  %v3211_v21 = vcombine.high %v840_v16, %v844_v17  ;;  %v3210_v27 = vcombine.low %v840_v16, %v844_v17 }
 0x23c   : > { %2516 = vmatmul.mubr.bf16.vlgmr.msra.gmra.mrb[8].mxu0 %v4099_v60  ;;  %2443 = vmatpush1.bf16.msra.mxu1 %v3144_v22  ;;  %v3162_v60 = vcombine.low %v792_v28, %v796_v29  ;;  %v847_v22 = vld [vmem:[#allocation11 + $0x650] sm:$0xff] }
 0x23d   : > { %2525 = vmatpush1.bf16.msra.mxu0 %v3146_v23  ;;  %2444 = vmatprep.subr.bf16.mxu1 %v3153_v24  ;;  %v851_v23 = vld [vmem:[#allocation11 + $0x670] sm:$0xff]  ;;  %v848_v24 = vld [vmem:[#allocation11 + $0x658] sm:$0xff] }
 0x23e   : > { %2526 = vmatprep.subr.bf16.mxu0 %v3155_v25  ;;  %2474 = vmatprep.mubr.bf16.mxu1 %v4103_v3  ;;  %v852_v25 = vld [vmem:[#allocation11 + $0x678] sm:$0xff]  ;;  %v3217_v28 = vcombine.high %v847_v22, %v851_v23  ;;  %v3216_v36 = vcombine.low %v847_v22, %v851_v23 }
 0x23f   : > { %2556 = vmatprep.mubr.bf16.mxu0 %v4103_v3  ;;  %v3179_v3 = vcombine.high %v808_v45, %v812_v46  ;;  %v3219_v29 = vcombine.high %v848_v24, %v852_v25  ;;  %v3218_v37 = vcombine.low %v848_v24, %v852_v25 }
 0x240   : > { %2445 = vmatpush1.bf16.msra.mxu1 %v3152_v30  ;;  %v855_v30 = vld [vmem:[#allocation11 + $0x690] sm:$0xff] }
 0x241   : > { %2527 = vmatpush1.bf16.msra.mxu0 %v3154_v31  ;;  %2446 = vmatprep.subr.bf16.mxu1 %v3161_v59  ;;  %v859_v31 = vld [vmem:[#allocation11 + $0x6b0] sm:$0xff]  ;;  %v856_v59 = vld [vmem:[#allocation11 + $0x698] sm:$0xff] }
 0x242   : > { %2528 = vmatprep.subr.bf16.mxu0 %v3163_v34  ;;  %v860_v34 = vld [vmem:[#allocation11 + $0x6b8] sm:$0xff]  ;;  %v3225_v38 = vcombine.high %v855_v30, %v859_v31  ;;  %v3224_v43 = vcombine.low %v855_v30, %v859_v31  ;;  %v3489_v30 = vld [vmem:[#allocation13 + $0x48] sm:$0xff]  }
 0x243   : > { %v3227_v39 = vcombine.high %v856_v59, %v860_v34  ;;  %v3226_v44 = vcombine.low %v856_v59, %v860_v34  ;;  %v3490_v31 = vld [vmem:[#allocation13 + $0x8] sm:$0xff]   ;;  %v3491_v59 = vld [vmem:[#allocation13 + $0x50] sm:$0xff]  }
 0x244   : > { %2447 = vmatpush1.bf16.msra.mxu1 %v3160_v40  ;;  %v863_v40 = vld [vmem:[#allocation11 + $0x6d0] sm:$0xff] }
 0x245   : > { %2529 = vmatpush1.bf16.msra.mxu0 %v3162_v60  ;;  %2448 = vmatprep.subr.bf16.mxu1 %v3169_v41  ;;  %v867_v60 = vld [vmem:[#allocation11 + $0x6f0] sm:$0xff]  ;;  %v864_v41 = vld [vmem:[#allocation11 + $0x6d8] sm:$0xff] }
 0x246   : > { %2530 = vmatprep.subr.bf16.mxu0 %v3171_v42  ;;  %v868_v42 = vld [vmem:[#allocation11 + $0x6f8] sm:$0xff]  ;;  %v3233_v45 = vcombine.high %v863_v40, %v867_v60  ;;  %v3232_v50 = vcombine.low %v863_v40, %v867_v60  ;;  %v3492_v34 = vld [vmem:[#allocation13 + $0x10] sm:$0xff]   ;;  %v3498_v40 = vld [vmem:[#allocation13 + $0x28] sm:$0xff]  }
 0x247   : > { %v3235_v46 = vcombine.high %v864_v41, %v868_v42  ;;  %v3234_v51 = vcombine.low %v864_v41, %v868_v42  ;;  %v3499_v60 = vld [vmem:[#allocation13 + $0x70] sm:$0xff]   ;;  %v3501_v42 = vld [vmem:[#allocation13 + $0x78] sm:$0xff]  }
 0x248   : > { %2449 = vmatpush1.bf16.msra.mxu1 %v3168_v47  ;;  %v871_v47 = vld [vmem:[#allocation11 + $0x710] sm:$0xff] }
 0x249   : > { %2531 = vmatpush1.bf16.msra.mxu0 %v3170_v48  ;;  %2450 = vmatprep.subr.bf16.mxu1 %v3177_v49  ;;  %v875_v48 = vld [vmem:[#allocation11 + $0x730] sm:$0xff]  ;;  %v872_v49 = vld [vmem:[#allocation11 + $0x718] sm:$0xff] }
 0x24a   : > { %2532 = vmatprep.subr.bf16.mxu0 %v3179_v3  ;;  %v876_v3 = vld [vmem:[#allocation11 + $0x738] sm:$0xff]  ;;  %v3241_v52 = vcombine.high %v871_v47, %v875_v48  ;;  %v3240_v58 = vcombine.low %v871_v47, %v875_v48  ;;  %v3500_v41 = vld [vmem:[#allocation13 + $0x30] sm:$0xff]  }
 0x24b   : > { %v3243_v53 = vcombine.high %v872_v49, %v876_v3  ;;  %v3242_v61 = vcombine.low %v872_v49, %v876_v3 }
 0x24c   : > { %2451 = vmatpush1.bf16.msra.mxu1 %v3176_v54  ;;  %v879_v54 = vld [vmem:[#allocation11 + $0x750] sm:$0xff] }
 0x24d   : > { %2533 = vmatpush1.bf16.msra.mxu0 %v3178_v55  ;;  %2452 = vmatprep.subr.bf16.mxu1 %v3185_v56  ;;  %v883_v55 = vld [vmem:[#allocation11 + $0x770] sm:$0xff]  ;;  %v880_v56 = vld [vmem:[#allocation11 + $0x758] sm:$0xff] }
 0x24e   : > { %2534 = vmatprep.subr.bf16.mxu0 %v3187_v57  ;;  %v884_v57 = vld [vmem:[#allocation11 + $0x778] sm:$0xff]  ;;  %v3249_v62 = vcombine.high %v879_v54, %v883_v55  ;;  %v3248_v5 = vcombine.low %v879_v54, %v883_v55 }
 0x24f   : > { %v3251_v63 = vcombine.high %v880_v56, %v884_v57  ;;  %v3250_v7 = vcombine.low %v880_v56, %v884_v57 }
 0x250   : > { %2453 = vmatpush1.bf16.msra.mxu1 %v3184_v0  ;;  %v887_v0 = vld [vmem:[#allocation11 + $0x790] sm:$0xff] }
 0x251   : > { %2535 = vmatpush1.bf16.msra.mxu0 %v3186_v1  ;;  %2454 = vmatprep.subr.bf16.mxu1 %v3193_v2  ;;  %v891_v1 = vld [vmem:[#allocation11 + $0x7b0] sm:$0xff]  ;;  %v888_v2 = vld [vmem:[#allocation11 + $0x798] sm:$0xff] }
 0x252   : > { %2536 = vmatprep.subr.bf16.mxu0 %v3195_v4  ;;  %v892_v4 = vld [vmem:[#allocation11 + $0x7b8] sm:$0xff]  ;;  %v3257_v8 = vcombine.high %v887_v0, %v891_v1  ;;  %v3256_v14 = vcombine.low %v887_v0, %v891_v1 }
 0x253   : > { %v3259_v9 = vcombine.high %v888_v2, %v892_v4  ;;  %v3258_v15 = vcombine.low %v888_v2, %v892_v4  ;;  %v933_v2 = vsub.s32 7, %v4086_v32 }
 0x254   : > { %2455 = vmatpush1.bf16.msra.mxu1 %v3192_v10  ;;  %v895_v10 = vld [vmem:[#allocation11 + $0x7d0] sm:$0xff] }
 0x255   : > { %2537 = vmatpush1.bf16.msra.mxu0 %v3194_v11  ;;  %2456 = vmatprep.subr.bf16.mxu1 %v3201_v12  ;;  %v899_v11 = vld [vmem:[#allocation11 + $0x7f0] sm:$0xff]  ;;  %v896_v12 = vld [vmem:[#allocation11 + $0x7d8] sm:$0xff] }
 0x256   : > { %2538 = vmatprep.subr.bf16.mxu0 %v3203_v13  ;;  %v900_v13 = vld [vmem:[#allocation11 + $0x7f8] sm:$0xff]  ;;  %v3265_v16 = vcombine.high %v895_v10, %v899_v11 }
 0x257   : > { %v3267_v17 = vcombine.high %v896_v12, %v900_v13 }
 0x258   : > { %2457 = vmatpush1.bf16.msra.mxu1 %v3200_v18  ;;  %v3264_v18 = vcombine.low %v895_v10, %v899_v11 }
 0x259   : > { %2539 = vmatpush1.bf16.msra.mxu0 %v3202_v19  ;;  %2458 = vmatprep.subr.bf16.mxu1 %v3209_v20  ;;  %v3266_v19 = vcombine.low %v896_v12, %v900_v13 }
 0x25a   : > { %2540 = vmatprep.subr.bf16.mxu0 %v3211_v21 }
 0x25c   : > { %2459 = vmatpush1.bf16.msra.mxu1 %v3208_v26 }
 0x25d   : > { %2541 = vmatpush1.bf16.msra.mxu0 %v3210_v27  ;;  %2460 = vmatprep.subr.bf16.mxu1 %v3217_v28  ;;  %v3487_v28 = vld [vmem:[#allocation13 + $0x40] sm:$0xff]  }
 0x25e   : > { %2542 = vmatprep.subr.bf16.mxu0 %v3219_v29  ;;  %v3488_v29 = vld [vmem:[#allocation13] sm:$0xff]  }
 0x260   : > { %2461 = vmatpush1.bf16.msra.mxu1 %v3216_v36  ;;  %v3494_v36 = vld [vmem:[#allocation13 + $0x18] sm:$0xff]  }
 0x261   : > { %2543 = vmatpush1.bf16.msra.mxu0 %v3218_v37  ;;  %2462 = vmatprep.subr.bf16.mxu1 %v3225_v38  ;;  %v3495_v37 = vld [vmem:[#allocation13 + $0x60] sm:$0xff]  }
 0x262   : > { %2544 = vmatprep.subr.bf16.mxu0 %v3227_v39  ;;  %v3496_v38 = vld [vmem:[#allocation13 + $0x20] sm:$0xff]   ;;  %v3497_v39 = vld [vmem:[#allocation13 + $0x68] sm:$0xff]  }
 0x264   : > { %2463 = vmatpush1.bf16.msra.mxu1 %v3224_v43  ;;  %v3502_v43 = vld [vmem:[#allocation13 + $0x38] sm:$0xff]  }
 0x265   : > { %2545 = vmatpush1.bf16.msra.mxu0 %v3226_v44  ;;  %2464 = vmatprep.subr.bf16.mxu1 %v3233_v45  ;;  %v901_v44 = vld [vmem:[%s4239_s6] sm:$0xff]  ;;  %v913_v45 = vsub.s32 2, %v4086_v32 }
 0x266   : > { %2546 = vmatprep.subr.bf16.mxu0 %v3235_v46  ;;  %v917_v46 = vsub.s32 3, %v4086_v32  ;;  %v906_v47 = vrot.slane %v901_v44, %v482_v33  ;;  %v910_v49 = vrot.slane %v901_v44, %v486_v35  ;;  %v921_v33 = vsub.s32 4, %v4086_v32 }
 0x267   : > { %v914_v48 = vrot.slane %v901_v44, %v913_v45  ;;  %v929_v35 = vsub.s32 6, %v4086_v32  ;;  %v934_v11 = vrot.slane %v901_v44, %v933_v2 }
 0x268   : > { %2465 = vmatpush1.bf16.msra.mxu1 %v3232_v50  ;;  %v918_v3 = vrot.slane %v901_v44, %v917_v46 }
 0x269   : > { %2547 = vmatpush1.bf16.msra.mxu0 %v3234_v51  ;;  %2466 = vmatprep.subr.bf16.mxu1 %v3241_v52 }
 0x26a   : > { %2548 = vmatprep.subr.bf16.mxu0 %v3243_v53 }
 0x26c   : > { %2467 = vmatpush1.bf16.msra.mxu1 %v3240_v58 }
 0x26d   : > { %2549 = vmatpush1.bf16.msra.mxu0 %v3242_v61  ;;  %2468 = vmatprep.subr.bf16.mxu1 %v3249_v62 }
 0x26e   : > { %2550 = vmatprep.subr.bf16.mxu0 %v3251_v63  ;;  %v925_v63 = vsub.s32 5, %v4086_v32 }
 0x270   : > { %2469 = vmatpush1.bf16.msra.mxu1 %v3248_v5  ;;  %v926_v10 = vrot.slane %v901_v44, %v925_v63 }
 0x271   : > { %2551 = vmatpush1.bf16.msra.mxu0 %v3250_v7  ;;  %2470 = vmatprep.subr.bf16.mxu1 %v3257_v8  ;;  %v922_v7 = vrot.slane %v901_v44, %v921_v33 }
 0x272   : > { %2552 = vmatprep.subr.bf16.mxu0 %v3259_v9  ;;  %v930_v9 = vrot.slane %v901_v44, %v929_v35 }
 0x274   : > { %2471 = vmatpush1.bf16.msra.mxu1 %v3256_v14 }
 0x275   : > { %2553 = vmatpush1.bf16.msra.mxu0 %v3258_v15  ;;  %2472 = vmatprep.subr.bf16.mxu1 %v3265_v16 }
 0x276   : > { %2554 = vmatprep.subr.bf16.mxu0 %v3267_v17 }
 0x278   : > { %2473 = vmatpush1.bf16.msra.mxu1 %v3264_v18 }
 0x279   : > { %2555 = vmatpush1.bf16.msra.mxu0 %v3266_v19  ;;  %3306 = vmatprep.subr.bf16.mxu1 %v3487_v28  ;;  %v2603_v28 = vld [vmem:[#allocation3] sm:$0xff] }
 0x27b   : > { %2475 = vmatmul.mubr.bf16.vlgmr.msra.gmra.mrb[4].mxu1 %v4109_v6 }
 0x27c   : > { %2557 = vmatmul.mubr.bf16.vlgmr.msra.gmra.mrb[8].mxu0 %v4109_v6  ;;  %3307 = vmatpush3.bf16.msra.mxu1 %v3488_v29  ;;  %v3493_v6 = vld [vmem:[#allocation13 + $0x58] sm:$0xff]  }
 0x27d   : > { %3308 = vmatprep.subr.bf16.mxu1 %v3489_v30  ;;  %v2604_v30 = vld [vmem:[#allocation3 + $0x8] sm:$0xff] }
 0x280   : > { %3309 = vmatpush3.bf16.msra.mxu1 %v3490_v31 }
 0x281   : > { %3310 = vmatprep.subr.bf16.mxu1 %v3491_v59 }
 0x284   : > { %3311 = vmatpush3.bf16.msra.mxu1 %v3492_v34 }
 0x285   : > { %3312 = vmatprep.subr.bf16.mxu1 %v3493_v6 }
 0x288   : > { %3313 = vmatpush3.bf16.msra.mxu1 %v3494_v36 }
 0x289   : > { %3314 = vmatprep.subr.bf16.mxu1 %v3495_v37 }
 0x28c   : > { %3315 = vmatpush3.bf16.msra.mxu1 %v3496_v38 }
 0x28d   : > { %3316 = vmatprep.subr.bf16.mxu1 %v3497_v39 }
 0x290   : > { %3317 = vmatpush3.bf16.msra.mxu1 %v3498_v40 }
 0x291   : > { %3318 = vmatprep.subr.bf16.mxu1 %v3499_v60 }
 0x294   : > { %3319 = vmatpush3.bf16.msra.mxu1 %v3500_v41 }
 0x295   : > { %3320 = vmatprep.subr.bf16.mxu1 %v3501_v42 }
 0x298   : > { %3321 = vmatpush3.bf16.msra.mxu1 %v3502_v43 }
 0x2ce   : > { %v2312_v20 = vpop.f32.mrb[0].mxu1  ;;  %v2394_v21 = vpop.f32.mrb[4].mxu0 }
 0x2cf   : > { %v2314_v22 = vpop.f32.mrb[1].mxu1  ;;  %v2396_v23 = vpop.f32.mrb[5].mxu0  ;;  %v3328_v50 = vadd.f32 %v2312_v20, %v906_v47  ;;  %v3330_v51 = vadd.f32 %v2394_v21, %v914_v48 }
 0x2d0   : > { %v2316_v24 = vpop.f32.mrb[2].mxu1  ;;  %v2398_v25 = vpop.f32.mrb[6].mxu0  ;;  %v3329_v52 = vadd.f32 %v2314_v22, %v910_v49  ;;  %v3331_v53 = vadd.f32 %v2396_v23, %v918_v3 }
 0x2d1   : > { %v2317_v26 = vpop.f32.mrb[3].mxu1  ;;  %v2399_v27 = vpop.f32.mrb[7].mxu0  ;;  %v3268_v54 = vmul.f32 -1.442695, %v3328_v50  ;;  %v3270_v55 = vmul.f32 -1.442695, %v3330_v51 }
 0x2d2   : > { %v3269_v56 = vmul.f32 -1.442695, %v3329_v52  ;;  %v3271_v57 = vmul.f32 -1.442695, %v3331_v53  ;;  %v3274_v51 = vld [vmem:[%s4241_s8] ss:$0 sm:$0xff] }
 0x2d3   : > { %3507 = vpow2.f32 %v3268_v54 }
 0x2d4   : > { %3509 = vpow2.f32 %v3270_v55 }
 0x2d5   : > { %3511 = vpow2.f32 %v3269_v56 }
 0x2d6   : > { %3513 = vpow2.f32 %v3271_v57 }
 0x2dd   : > { %v3508_v58 = vpop.eup %3507 }
 0x2de   : > { %v3510_v61 = vpop.eup %3509  ;;  %v2571_v1 = vadd.f32 1.0, %v3508_v58 }
 0x2df   : > { %v3512_v62 = vpop.eup %3511  ;;  %v2583_v4 = vadd.f32 1.0, %v3510_v61 }
 0x2e0   : > { %v3514_v0 = vpop.eup %3513  ;;  %v2572_v5 = vadd.f32 1.0, %v3512_v62  ;;  %3515 = vrcp.f32 %v2571_v1 }
 0x2e1   : > { %v2584_v8 = vadd.f32 1.0, %v3514_v0  ;;  %3517 = vrcp.f32 %v2583_v4 }
 0x2e2   : > { %3519 = vrcp.f32 %v2572_v5 }
 0x2e3   : > { %3521 = vrcp.f32 %v2584_v8 }
 0x2ea   : > { %v3516_v25 = vpop.eup %3515 }
 0x2eb   : > { %v3518_v26 = vpop.eup %3517 }
 0x2ec   : > { %v3520_v27 = vpop.eup %3519  ;;  %v2605_v34 = vmul.f32 %v3518_v26, %v2603_v28 }
 0x2ed   : > { %v3522_v29 = vpop.eup %3521 }
 0x2ee   : > { %v2606_v36 = vmul.f32 %v3522_v29, %v2604_v30 }
 0x34e   : > { %v2476_v12 = vpop.f32.mrb[4].mxu1 }
 0x34f   : > { %v3332_v13 = vadd.f32 %v2476_v12, %v922_v7  ;;  %v2558_v14 = vpop.f32.mrb[8].mxu0  ;;  %v2478_v15 = vpop.f32.mrb[5].mxu1 }
 0x350   : > { %v3334_v16 = vadd.f32 %v2558_v14, %v930_v9  ;;  %v3333_v17 = vadd.f32 %v2478_v15, %v926_v10  ;;  %v2560_v18 = vpop.f32.mrb[9].mxu0  ;;  %v2480_v19 = vpop.f32.mrb[6].mxu1 }
 0x351   : > { %3523 = vtanh.f32 %v3332_v13  ;;  %v3335_v32 = vadd.f32 %v2560_v18, %v934_v11  ;;  %v2562_v20 = vpop.f32.mrb[10].mxu0  ;;  %v2481_v21 = vpop.f32.mrb[7].mxu1 }
 0x352   : > { %v3272_v22 = vmul.f32 -1.442695, %v3334_v16  ;;  %3525 = vtanh.f32 %v3333_v17  ;;  %v2563_v23 = vpop.f32.mrb[11].mxu0 }
 0x353   : > { %v3273_v24 = vmul.f32 -1.442695, %v3335_v32 }
 0x354   : > { %3527 = vpow2.f32 %v3272_v22 }
 0x355   : > { %3529 = vpow2.f32 %v3273_v24 }
 0x35b   : > { %v3524_v31 = vpop.eup %3523 }
 0x35c   : > { %v3526_v59 = vpop.eup %3525  ;;  %v2607_v6 = vmul.f32 %v3524_v31, %v3516_v25 }
 0x35d   : > { %v2608_v37 = vmul.f32 %v3526_v59, %v3520_v27 }
 0x35e   : > { %v3528_v38 = vpop.eup %3527  ;;  %v2609_v39 = vadd.f32 %v2607_v6, %v2605_v34 }
 0x35f   : > { %v3530_v40 = vpop.eup %3529  ;;  %v2597_v60 = vadd.f32 1.0, %v3528_v38  ;;  %v2610_v41 = vadd.f32 %v2608_v37, %v2606_v36 }
 0x360   : > { %3531 = vtanh.f32 %v2609_v39  ;;  %2617 = vst [vmem:[#allocation3] sm:$0xff] %v2609_v39  ;;  %v2598_v42 = vadd.f32 1.0, %v3530_v40  ;;  %2803 = vst [vmem:[#allocation17] sm:$0xff] (!%p3291_p3), %v2609_v39 }
 0x361   : > { %3533 = vrcp.f32 %v2597_v60  ;;  %2618 = vst [vmem:[#allocation3 + $0x8] sm:$0xff] %v2610_v41  ;;  %2804 = vst [vmem:[#allocation17 + $0x8] sm:$0xff] (!%p3291_p3), %v2610_v41 }
 0x362   : > { %3535 = vtanh.f32 %v2610_v41 }
 0x363   : > { %3537 = vrcp.f32 %v2598_v42 }
 0x36a   : > { %v3532_v43 = vpop.eup %3531 }
 0x36b   : > { %v3534_v44 = vpop.eup %3533 }
 0x36c   : > { %v3536_v45 = vpop.eup %3535  ;;  %v2613_v46 = vmul.f32 %v3534_v44, %v3532_v43 }
 0x36d   : > { %v3538_v47 = vpop.eup %3537 }
 0x36e   : > { %v2614_v48 = vmul.f32 %v3538_v47, %v3536_v45  ;;  %2615 = vst [vmem:[#allocation2] sm:$0xff] %v2613_v46  ;;  %v2619_v3 = vpack.c.bf16 %v2613_v46, %v2613_v46  ;;  %2801 = vst [vmem:[#allocation15] sm:$0xff] (!%p3291_p3), %v2613_v46 }
 0x370   : > { %2616 = vst [vmem:[#allocation2 + $0x8] sm:$0xff] %v2614_v48  ;;  %v2620_v49 = vpack.c.bf16 %v2614_v48, %v2614_v48  ;;  %2802 = vst [vmem:[#allocation15 + $0x8] sm:$0xff] (!%p3291_p3), %v2614_v48 }
 0x372   : > { %2788 = vmatprep.mubr.bf16.mxu1 %v2620_v49 }
 0x373   : > { %2789 = vmatmul.mubr.bf16.vlgmr.msra.gmra.mrb[8].mxu1 %v2619_v3 }
 0x446   : > { %v3322_v50 = vpop.f32.mrb[8].mxu1  ;;  %2800 = sbr.rel (%p3291_p3) target bundleno = 1101 (0x44d), region = 84 }
 0x447   : > { %v3323_v52 = vpop.f32.mrb[9].mxu1 }
 0x448   : > { %v3324_v53 = vadd.f32 %v3323_v52, %v3322_v50  ;;  %v3325_v54 = vpop.f32.mrb[10].mxu1 }
 0x449   : > { %v3326_v55 = vpop.f32.mrb[11].mxu1 }
 0x44a   : > { %v2791_v56 = vadd.f32 %v3324_v53, %v3274_v51 }
 0x44c   : > { %2796 = vst [vmem:[%s438_s30] sm:$0xff] %v2791_v56 }
 0x44d PF: > { %s3823_s14 = smov [#allocation15]   ;;  %s3293_s1 = sshll.u32 %s3907_s21, 7 }
 0x44e   : > { %s2830_s28 = sshll.u32 %s3823_s14, 4  ;;  %s4144_s26 = scalar_lea.hbm %s4242_s9, %s3293_s1  ;;  %s2831_s28 = int_to_ptr.vmem [resolvable:$true] %s2830_s28 }
 0x44f   : > { %s3679_s23 = scalar_lea.vmem %s2831_s28, 256  ;;  %p4276_p7 = scmp.eq.s32.totalorder %s3907_s21, 3 }
 0x450   : > { %p3680_p4 = scmp.ne.s32.totalorder %s2831_s28, %s3679_s23  ;;  %p3686_p2 = scmp.lt.s32.totalorder %s2831_s28, %s2831_s28 }
 0x451   : > { %p3687_p0 = scmp.lt.s32.totalorder %s3679_s23, %s3679_s23 }
 0x452   : > { %p3681_p8 = pnand %p3680_p4, %p4276_p7 }
 0x453   : > { %p3688_p1 = por %p3687_p0, %p3686_p2 }
 0x454   : > { %p3682_p12 = pneg %p3681_p8 }
 0x456   : > { %p3689_p6 = pnand %p3688_p1, %p3682_p12 }
 0x458   : > { %3692 = shalt.err (!%p3689_p6)
}
 0x459   : > { %s3693_s24 = scalar_lea.hbm %s4243_s10, 256  ;;  %p4277_p9 = pmov %p4276_p7 }
 0x45a   : > { %p3694_p5 = scmp.ne.s32.totalorder %s4243_s10, %s3693_s24  ;;  %p3699_p11 = scmp.lt.u32.totalorder %s3693_s24, %s4243_s10 }
 0x45c   : > { %p3695_p13 = pnand %p3694_p5, %p4277_p9 }
 0x45e   : > { %p3696_p10 = pneg %p3695_p13 }
 0x460   : > { %p3701_p3 = pnand %p3699_p11, %p3696_p10 }
 0x462   : > { %3704 = shalt.err (!%p3701_p3)
}
 0x463   : > { %p4278_p4 = pmov %p4276_p7  ;;  %s2819_s13 = sshll.u32 %s438_s30, 4  ;;  %s4166_s13 = int_to_ptr.vmem [resolvable:$true] %s2819_s13 }
 0x464   : > { %s3824_s2 = smov [#allocation17]   ;;  %s2806_s25 = scalar_lea.sflag [#allocation7], %s436_s29 }
 0x465   : > { %3374 = dma.vmem_to_hbm [thread:$0]  (%p4278_p4), %s2831_s28, 256, %s4243_s10, [#allocation16]  }
 0x466   : > { %s4168_s23 = sshll.u32 %s3824_s2, 4  ;;  %s3705_s16 = scalar_lea.vmem %s4166_s13, 128  ;;  %s2842_s23 = int_to_ptr.vmem [resolvable:$true] %s4168_s23 }
 0x467   : > { %p3706_p7 = scmp.ne.s32.totalorder %s4166_s13, %s3705_s16  ;;  %p4279_p8 = scmp.ne.s32.totalorder %s4260_s27, 0 }
 0x468   : > { %s3825_s24 = smov [#allocation14]  }
 0x469   : > { %p3707_p12 = pnand %p3706_p7, %p4279_p8  ;;  %s3709_s12 = sshll.u32 %s3825_s24, 4  ;;  %s3710_s12 = int_to_ptr.vmem [resolvable:$false] %s3709_s12 }
 0x46a   : > { %s3711_s15 = scalar_lea.vmem %s3710_s12, 256  ;;  %p3712_p0 = scmp.lt.s32.totalorder %s4166_s13, %s3710_s12 }
 0x46b   : > { %p3708_p2 = pneg %p3707_p12  ;;  %p3713_p1 = scmp.lt.s32.totalorder %s3711_s15, %s3705_s16 }
 0x46d   : > { %p3714_p6 = por %p3713_p1, %p3712_p0 }
 0x46f   : > { %p3715_p5 = pnand %p3714_p6, %p3708_p2 }
 0x471   : > { %3718 = shalt.err (!%p3715_p5)
}
 0x472   : > { %s3719_s29 = scalar_lea.hbm %s4144_s26, 128  ;;  %s3723_s22 = scalar_lea.hbm %s4242_s9, 512 }
 0x473   : > { %p3720_p9 = scmp.ne.s32.totalorder %s4144_s26, %s3719_s29  ;;  %p3724_p11 = scmp.lt.u32.totalorder %s4144_s26, %s4242_s9 }
 0x474   : > { %p3725_p3 = scmp.lt.u32.totalorder %s3723_s22, %s3719_s29  ;;  %p3727_p7 = scmp.lt.u32.totalorder %s3719_s29, %s4144_s26 }
 0x475   : > { %p3721_p13 = pnand %p3720_p9, %p4279_p8 }
 0x476   : > { %p3726_p4 = por %p3725_p3, %p3724_p11 }
 0x477   : > { %p3722_p10 = pneg %p3721_p13 }
 0x478   : > { %p3728_p12 = por %p3727_p7, %p3726_p4 }
 0x47a   : > { %p3729_p2 = pnand %p3728_p12, %p3722_p10 }
 0x47c   : > { %3732 = shalt.err (!%p3729_p2)
}
 0x47d   : > { %3372 = dma.vmem_to_hbm [thread:$0]  (%p4279_p8), %s4166_s13, 128, %s4144_s26, %s2806_s25  }
 0x47e   : > { %s3733_s14 = scalar_lea.vmem %s2842_s23, 256  ;;  %p4280_p1 = scmp.eq.s32.totalorder %s3907_s21, 3 }
 0x47f   : > { %p3734_p0 = scmp.ne.s32.totalorder %s2842_s23, %s3733_s14  ;;  %p3740_p9 = scmp.lt.s32.totalorder %s2842_s23, %s2842_s23 }
 0x480   : > { %p3741_p13 = scmp.lt.s32.totalorder %s3733_s14, %s3733_s14 }
 0x481   : > { %p3735_p6 = pnand %p3734_p0, %p4280_p1 }
 0x482   : > { %p3742_p11 = por %p3741_p13, %p3740_p9 }
 0x483   : > { %p3736_p5 = pneg %p3735_p6 }
 0x485   : > { %p3743_p3 = pnand %p3742_p11, %p3736_p5 }
 0x487   : > { %3746 = shalt.err (!%p3743_p3)
}
 0x488   : > { %s3747_s27 = scalar_lea.hbm %s4244_s11, 256  ;;  %p4281_p10 = pmov %p4280_p1 }
 0x489   : > { %p3748_p8 = scmp.ne.s32.totalorder %s4244_s11, %s3747_s27  ;;  %p3753_p12 = scmp.lt.u32.totalorder %s3747_s27, %s4244_s11 }
 0x48b   : > { %p3749_p4 = pnand %p3748_p8, %p4281_p10 }
 0x48d   : > { %p3750_p7 = pneg %p3749_p4 }
 0x48f   : > { %p3755_p2 = pnand %p3753_p12, %p3750_p7 }
 0x491   : > { %3758 = shalt.err (!%p3755_p2)
}
 0x492   : > { %p4282_p0 = pmov %p4280_p1 }
 0x494   : > { %3376 = dma.vmem_to_hbm [thread:$0]  (%p4282_p0), %s2842_s23, 256, %s4244_s11, [#allocation16]  }
 0x495   : > { %p4283_p1 = pmov %p4282_p0 }
 0x496   : > { %p4284_p6 = pmov %p4282_p0 }
 0x497   : > { %3788 = dma.done.wait (%p4283_p1), [#allocation16], 512  }
 0x498   : > { %3790 = vsyncadd (%p4284_p6), [#allocation16], 4294966784 }
 0x499 PF: > { %s4285_s15 = sld [smem:[#allocation23_spill]]  ;;  %s4286_s29 = sld [smem:[#allocation27_spill]] }
 0x49a   : > { %p3416_p5 = scmp.ge.s32.totalorder %s3809_s20, 2 }
 0x49f   : > { %s2861_s30 = sand.u32 1, %s4285_s15   ;;  %p4287_p9 = scmp.ne.s32.totalorder %s4286_s29, 0 }
 0x4a0   : > { %s2862_s28 = scalar_lea.sflag [#allocation7], %s2861_s30 }
 0x4a1   : > { %p3399_p13 = pnand %p3416_p5, %p4287_p9 }
 0x4a3   : > { %3792 = dma.done.wait (!%p3399_p13), %s2862_s28, 128  }
 0x4a4   : > { %3794 = vsyncadd (!%p3399_p13), %s2862_s28, 4294967168  ;;  %s4288_s20 = sld [smem:[#allocation25_spill]]  ;;  %s4289_s22 = sld [smem:[#allocation24_spill]] }
 0x4a5   : > { %s4290_s19 = sld [smem:[#allocation26_spill]]  ;;  %s4291_s17 = smov %s3801_s18 }
 0x4aa   : > { %p26_p11 = scmp.ge.s32.totalorder %s4288_s20, 6   ;;  %s4292_s18 = smov %s4289_s22 }
 0x4ac   :  { %28 = sbr.rel (!%p26_p11) target bundleno = 10 (0xa), region = 136 }
 0x4b3   :  { %2867 = vsyncpa [#allocation6], 1 }
 0x4b4   :  { %2869 = vsyncpa [#allocation6 + $0x1], 1 }
 0x4b5   :  { %2870 = vsyncpa [#allocation9], 1 }
 0x4b6   :  { %2871 = vsyncpa [#allocation12], 1 }
 0x4b7   :  { %2872 = vsyncpa [#allocation7], 1 }
 0x4b8   :  { %2874 = vsyncpa [#allocation7 + $0x1], 1 }
 0x4b9   :  { %2875 = vsyncpa [#allocation16], 1 }

</bundles_post_ra>
